<compile_context>
chip_gen: v5e
topology: v5e:2x2
jax: 0.10.0
libtpu: 0.0.40
codegen_flags: <defaults>
</compile_context>

<pallas_src>
import functools

import jax
import jax.numpy as jnp
from jax.experimental import pallas as pl
from jax.experimental.pallas import tpu as pltpu


def _round_up(n, m):
    return ((n + m - 1) // m) * m


def _cdiv(a, b):
    return -(-a // b)


# ----------------------------------------------------------------------------
# Kernel
# ----------------------------------------------------------------------------
def _flow_vae_kernel(
    # packed batch tile: [x | eps]  -> (TB, 2D) f32
    xe_ref,
    # encoder weights (bf16) / biases (f32)
    ew0, eb0, ew1, eb1, ew2, eb2, ew3, eb3,
    # fused full-width flow weights, stacked over layers
    fw1, fb1, fw2, fb2,
    # decoder weights / biases
    dw0, db0, dw1, db1, dw2, db2, dw3, db3,
    # packed output: [x_recon | mu | std | log_det | pad] -> (TB, pack_width)
    out_ref,
    *, num_flows: int, dim: int, n_chunks: int,
):
    D = dim
    f32, bf16 = jnp.float32, jnp.bfloat16

    def dense(h, w_ref, b_ref, relu):
        y = jnp.dot(h.astype(bf16), w_ref[...], preferred_element_type=f32) + b_ref[...]
        return jnp.maximum(y, 0.0) if relu else y

    def net(x, eps):
        # ----- encoder: Linear->ReLU x3 -> Linear --------------------------
        h = dense(x, ew0, eb0, True)
        h = dense(h, ew1, eb1, True)
        h = dense(h, ew2, eb2, True)
        h = dense(h, ew3, eb3, False)                 # (rows, 2D)
        mu = h[:, :D]
        sr = h[:, D:]
        std = jnp.maximum(sr, 0.0) + jnp.log(1.0 + jnp.exp(-jnp.abs(sr))) + 1e-6

        # ----- reparameterization ------------------------------------------
        z = mu + std * eps                            # (rows, D)

        # ----- normalizing flow (full-width z; flip encoded in the weights) -
        logdet = jnp.zeros((x.shape[0], 1), f32)
        for l in range(num_flows):
            # fused scale/shift first layers: one (D -> 2D) matmul
            hcat = jnp.maximum(
                jnp.dot(z.astype(bf16), fw1[l], preferred_element_type=f32) + fb1[l],
                0.0)                                  # (rows, 2D)  = [h_s | h_t]
            # fused scale/shift second layers: one block-structured (2D -> 2D)
            st = jnp.dot(hcat.astype(bf16), fw2[l], preferred_element_type=f32) + fb2[l]
            s = jnp.tanh(st[:, :D])                   # 0 on the untransformed half
            t = st[:, D:]                             # 0 on the untransformed half
            z = z * jnp.exp(s) + t                    # exp(0)=1 keeps that half fixed
            logdet = logdet + jnp.sum(s, axis=1, keepdims=True)

        # ----- decoder: Linear->ReLU x3 -> Linear ---------------------------
        h = dense(z, dw0, db0, True)
        h = dense(h, dw1, db1, True)
        h = dense(h, dw2, db2, True)
        xr = dense(h, dw3, db3, False)                # (rows, D)
        return xr, mu, std, logdet

    tb = xe_ref.shape[0]
    sub = tb // n_chunks
    # Independent row sub-chunks -> independent dependency chains the LLO
    # scheduler can interleave (hides MXU push/drain + EUP latency).
    for c in range(n_chunks):
        rows = pl.ds(c * sub, sub)
        xe = xe_ref[rows, :]
        xr, mu, std, logdet = net(xe[:, :D], xe[:, D:])
        out_ref[rows, pl.ds(0, D)] = xr
        out_ref[rows, pl.ds(D, D)] = mu
        out_ref[rows, pl.ds(2 * D, D)] = std
        out_ref[rows, pl.ds(3 * D, 1)] = logdet


_WEIGHT_ORDER = (
    "enc_w0", "enc_b0", "enc_w1", "enc_b1", "enc_w2", "enc_b2", "enc_w3", "enc_b3",
    "flow_w1", "flow_b1", "flow_w2", "flow_b2",
    "dec_w0", "dec_b0", "dec_w1", "dec_b1", "dec_w2", "dec_b2", "dec_w3", "dec_b3",
)


# ----------------------------------------------------------------------------
# Wrapper
# ----------------------------------------------------------------------------
def flow_vae_forward(x, eps, params, *, num_flows, block_b=1024):
    """Full FlowVAE forward. Returns (x_recon, mu, std, log_det)."""
    B, D = x.shape
    L = num_flows
    pack_width = _round_up(3 * D + 1, 128)

    # Balanced batch tiling (multiple of 8 sublanes).  Use >=2 tiles whenever the
    # batch allows so the "parallel" grid axis can actually shard across both
    # TensorCores on v7x; cap the tile at block_b.
    desired_tiles = max(_cdiv(B, block_b), min(2, max(B // 8, 1)))
    TB = _round_up(_cdiv(B, desired_tiles), 8)
    num_tiles = _cdiv(B, TB)
    Bp = num_tiles * TB

    # Interleave two row sub-chunks inside the kernel when the tile is big enough.
    n_chunks = 2 if (TB % 16 == 0 and TB >= 16) else 1

    # Pack x and eps into one lane-contiguous input tile.
    xe = jnp.concatenate([x, eps], axis=1)            # (B, 2D)
    if Bp != B:
        xe = jnp.pad(xe, ((0, Bp - B), (0, 0)))

    weights = [params[k] for k in _WEIGHT_ORDER]
    weight_bytes = sum(int(w.size) * w.dtype.itemsize for w in weights)

    # Generation-aware VMEM capacity (128 MiB on v5e/v6e, 64 MiB on v7x).
    try:
        hw_vmem = int(pltpu.get_tpu_info().vmem_capacity_bytes)
    except Exception:
        hw_vmem = 64 << 20

    kernel = functools.partial(_flow_vae_kernel, num_flows=L, dim=D, n_chunks=n_chunks)

    flops_per_row = 2 * (
        D * 2 * D + 3 * (2 * D * 2 * D)               # encoder
        + L * (D * 2 * D + 2 * D * 2 * D)             # flow layers (fused)
        + D * 2 * D + 2 * (2 * D * 2 * D) + 2 * D * D # decoder
    )
    cost = pl.CostEstimate(
        flops=Bp * flops_per_row,
        transcendentals=Bp * (2 * D + L * 2 * D),
        bytes_accessed=weight_bytes + Bp * 2 * D * 4 + Bp * pack_width * 4,
    )

    out_shape = jax.ShapeDtypeStruct((Bp, pack_width), jnp.float32)
    out_spec = pl.BlockSpec((TB, pack_width), lambda i: (i, 0))
    in_row_spec = pl.BlockSpec((TB, 2 * D), lambda i: (i, 0))

    def run(single_buffer_weights):
        def const_spec(shape):
            nd = len(shape)

            def idx(i):
                return (0,) * nd

            if single_buffer_weights:
                # Constant block index -> a single resident buffer is enough.
                return pl.BlockSpec(shape, idx, pipeline_mode=pl.Buffered(1))
            return pl.BlockSpec(shape, idx)

        wfac = 1 if single_buffer_weights else 2       # Pallas default double-buffers
        vmem_need = (
            wfac * weight_bytes
            + 2 * TB * 2 * D * 4                       # input tiles (double-buffered)
            + 2 * TB * pack_width * 4                  # output tiles (double-buffered)
            + 12 * TB * 2 * D * 4                      # live f32 intermediates
            + (4 << 20)                                # headroom
        )
        vmem_limit = int(min(max(vmem_need, 32 << 20), hw_vmem - (4 << 20)))

        out = pl.pallas_call(
            kernel,
            out_shape=out_shape,
            grid_spec=pltpu.PrefetchScalarGridSpec(
                num_scalar_prefetch=0,
                grid=(num_tiles,),
                in_specs=[in_row_spec] + [const_spec(w.shape) for w in weights],
                out_specs=out_spec,
            ),
            compiler_params=pltpu.CompilerParams(
                dimension_semantics=("parallel",),
                vmem_limit_bytes=vmem_limit,
            ),
            cost_estimate=cost,
        )(xe, *weights)
        return jax.block_until_ready(out)

    try:
        packed = run(True)
    except Exception:
        # TODO(synk): pl.Buffered(1) single-buffering rejected on this Pallas
        # version - fall back to default double-buffered weight blocks.
        packed = run(False)

    x_recon = packed[:B, :D]
    mu = packed[:B, D:2 * D]
    std = packed[:B, 2 * D:3 * D]
    log_det = packed[:B, 3 * D]
    return x_recon, mu, std, log_det


# ----------------------------------------------------------------------------
# Parameter init (mimics nn.Linear defaults; weights stored pre-transposed
# (in, out) in bf16 for the MXU, biases kept f32 as (1, out) rows).
# ----------------------------------------------------------------------------
def init_flow_vae_params(key, input_dim, num_flows=4):
    D = input_dim
    half = D // 2
    f32, bf16 = jnp.float32, jnp.bfloat16
    keys = iter(jax.random.split(key, 2 * (8 + 4 * num_flows)))

    def lin(fan_in, fan_out):
        bound = 1.0 / (fan_in ** 0.5)
        w = jax.random.uniform(next(keys), (fan_in, fan_out), f32, -bound, bound)
        b = jax.random.uniform(next(keys), (1, fan_out), f32, -bound, bound)
        return w, b

    p = {}
    # encoder: D -> 2D -> 2D -> 2D -> 2D
    for i, (fi, fo) in enumerate([(D, 2 * D), (2 * D, 2 * D), (2 * D, 2 * D), (2 * D, 2 * D)]):
        w, b = lin(fi, fo)
        p[f"enc_w{i}"], p[f"enc_b{i}"] = w.astype(bf16), b

    # flow coupling layers: build full-width fused weights.
    #   W1 (D, 2D): rows of the DRIVING half hold [w1s | w1t], other rows zero.
    #   W2 (2D,2D): maps [h_s | h_t] -> [s_pre | t] placed on the TRANSFORMED
    #               half's columns; all other columns (and biases) are zero, so
    #               tanh(0)=0 / exp(0)=1 / +0 leaves the driving half unchanged
    #               - exactly the PyTorch cat([x1, y2]) / cat([y2, x1]) behavior.
    fw1, fb1, fw2, fb2, raw_flow = [], [], [], [], []
    for l in range(num_flows):
        flip = (l % 2 == 1)
        w1s, b1s = lin(half, D)
        w2s, b2s = lin(D, half)
        w1t, b1t = lin(half, D)
        w2t, b2t = lin(D, half)
        drive = slice(half, D) if flip else slice(0, half)
        trans = slice(0, half) if flip else slice(half, D)
        t_cols = slice(D + trans.start, D + trans.stop)

        W1 = jnp.zeros((D, 2 * D), f32)
        W1 = W1.at[drive, :D].set(w1s).at[drive, D:].set(w1t)
        B1 = jnp.concatenate([b1s, b1t], axis=1)                      # (1, 2D)

        W2 = jnp.zeros((2 * D, 2 * D), f32)
        W2 = W2.at[:D, trans].set(w2s).at[D:, t_cols].set(w2t)
        B2 = jnp.zeros((1, 2 * D), f32)
        B2 = B2.at[:, trans].set(b2s).at[:, t_cols].set(b2t)

        fw1.append(W1.astype(bf16)); fb1.append(B1)
        fw2.append(W2.astype(bf16)); fb2.append(B2)
        raw_flow.append(dict(w1s=w1s, b1s=b1s, w2s=w2s, b2s=b2s,
                             w1t=w1t, b1t=b1t, w2t=w2t, b2t=b2t))

    p["flow_w1"] = jnp.stack(fw1)     # (L, D, 2D)  bf16
    p["flow_b1"] = jnp.stack(fb1)     # (L, 1, 2D)  f32
    p["flow_w2"] = jnp.stack(fw2)     # (L, 2D, 2D) bf16
    p["flow_b2"] = jnp.stack(fb2)     # (L, 1, 2D)  f32
    p["_raw_flow"] = raw_flow         # unfused weights, reference-check only

    # decoder: D -> 2D -> 2D -> 2D -> D
    for i, (fi, fo) in enumerate([(D, 2 * D), (2 * D, 2 * D), (2 * D, 2 * D), (2 * D, D)]):
        w, b = lin(fi, fo)
        p[f"dec_w{i}"], p[f"dec_b{i}"] = w.astype(bf16), b
    return p


# ----------------------------------------------------------------------------
# Pure-JAX reference mirroring the PyTorch FlowVAE layer-by-layer (chunk/cat per
# coupling layer, UNFUSED flow weights) with matching bf16-matmul numerics.
# ----------------------------------------------------------------------------
def _reference_forward(x, eps, p, num_flows):
    f32, bf16 = jnp.float32, jnp.bfloat16
    D = x.shape[1]
    half = D // 2

    def linear(h, w, b):
        return jnp.dot(h.astype(bf16), w.astype(bf16), preferred_element_type=f32) + b

    h = jnp.maximum(linear(x, p["enc_w0"], p["enc_b0"]), 0.0)
    h = jnp.maximum(linear(h, p["enc_w1"], p["enc_b1"]), 0.0)
    h = jnp.maximum(linear(h, p["enc_w2"], p["enc_b2"]), 0.0)
    h = linear(h, p["enc_w3"], p["enc_b3"])
    mu, sr = h[:, :D], h[:, D:]
    std = jnp.maximum(sr, 0.0) + jnp.log(1.0 + jnp.exp(-jnp.abs(sr))) + 1e-6
    z = mu + std * eps

    logdet = jnp.zeros((x.shape[0],), f32)
    for l in range(num_flows):
        raw = p["_raw_flow"][l]
        flip = (l % 2 == 1)
        if flip:
            x2, x1 = z[:, :half], z[:, half:]
        else:
            x1, x2 = z[:, :half], z[:, half:]
        hs = jnp.maximum(linear(x1, raw["w1s"], raw["b1s"]), 0.0)
        s = jnp.tanh(linear(hs, raw["w2s"], raw["b2s"]))
        ht = jnp.maximum(linear(x1, raw["w1t"], raw["b1t"]), 0.0)
        t = linear(ht, raw["w2t"], raw["b2t"])
        y2 = x2 * jnp.exp(s) + t
        z = jnp.concatenate([y2, x1], axis=1) if flip else jnp.concatenate([x1, y2], axis=1)
        logdet = logdet + jnp.sum(s, axis=1)

    h = jnp.maximum(linear(z, p["dec_w0"], p["dec_b0"]), 0.0)
    h = jnp.maximum(linear(h, p["dec_w1"], p["dec_b1"]), 0.0)
    h = jnp.maximum(linear(h, p["dec_w2"], p["dec_b2"]), 0.0)
    x_recon = linear(h, p["dec_w3"], p["dec_b3"])
    return x_recon, mu, std, logdet


if __name__ == "__main__":
    key = jax.random.PRNGKey(0)
    k_x, k_eps, k_p = jax.random.split(key, 3)

    B, input_dim, num_flows = 8, 32, 4
    x = jax.random.normal(k_x, (B, input_dim), jnp.float32)
    # TODO(synk): torch.randn_like noise is sampled here in JAX and fed to the
    # kernel (random bits are not bitwise reproducible vs PyTorch anyway).
    eps = jax.random.normal(k_eps, (B, input_dim), jnp.float32)
    params = init_flow_vae_params(k_p, input_dim, num_flows)

    x_recon, mu, std, log_det = flow_vae_forward(x, eps, params, num_flows=num_flows)
    jax.block_until_ready((x_recon, mu, std, log_det))

    # sanity check against a torch-style (unfused, chunk/cat) JAX reference
    xr_ref, mu_ref, std_ref, ld_ref = _reference_forward(x, eps, params, num_flows)
    assert x_recon.shape == (B, input_dim)
    assert mu.shape == (B, input_dim) and std.shape == (B, input_dim)
    assert log_det.shape == (B,)
    assert jnp.allclose(x_recon, xr_ref, atol=2e-2, rtol=2e-2)
    assert jnp.allclose(mu, mu_ref, atol=2e-2, rtol=2e-2)
    assert jnp.allclose(std, std_ref, atol=2e-2, rtol=2e-2)
    assert jnp.allclose(log_det, ld_ref, atol=5e-2, rtol=5e-2)

    print("KERNEL_OK")
</pallas_src>

<mosaic_0001>
module attributes {stable_mosaic.version = 11 : i64} {
  func.func @_flow_vae_kernel(%arg0: i32, %arg1: memref<8x64xf32, #tpu.memory_space<vmem>>, %arg2: memref<32x64xbf16, #tpu.memory_space<vmem>>, %arg3: memref<1x64xf32, #tpu.memory_space<vmem>>, %arg4: memref<64x64xbf16, #tpu.memory_space<vmem>>, %arg5: memref<1x64xf32, #tpu.memory_space<vmem>>, %arg6: memref<64x64xbf16, #tpu.memory_space<vmem>>, %arg7: memref<1x64xf32, #tpu.memory_space<vmem>>, %arg8: memref<64x64xbf16, #tpu.memory_space<vmem>>, %arg9: memref<1x64xf32, #tpu.memory_space<vmem>>, %arg10: memref<4x32x64xbf16, #tpu.memory_space<vmem>>, %arg11: memref<4x1x64xf32, #tpu.memory_space<vmem>>, %arg12: memref<4x64x64xbf16, #tpu.memory_space<vmem>>, %arg13: memref<4x1x64xf32, #tpu.memory_space<vmem>>, %arg14: memref<32x64xbf16, #tpu.memory_space<vmem>>, %arg15: memref<1x64xf32, #tpu.memory_space<vmem>>, %arg16: memref<64x64xbf16, #tpu.memory_space<vmem>>, %arg17: memref<1x64xf32, #tpu.memory_space<vmem>>, %arg18: memref<64x64xbf16, #tpu.memory_space<vmem>>, %arg19: memref<1x64xf32, #tpu.memory_space<vmem>>, %arg20: memref<64x32xbf16, #tpu.memory_space<vmem>>, %arg21: memref<1x32xf32, #tpu.memory_space<vmem>>, %arg22: memref<8x128xf32, #tpu.memory_space<vmem>>) attributes {dimension_semantics = [#tpu.dimension_semantics<parallel>], iteration_bounds = array<i64: 1>, scalar_prefetch = 0 : i64, scratch_operands = 0 : i64, tpu.core_type = #tpu.core_type<tc>, window_params = [{transform_indices = @transform_0, window_bounds = array<i64: 8, 64>}, {pipeline_mode = #tpu.pipeline_mode<synchronous>, transform_indices = @transform_1, window_bounds = array<i64: 32, 64>}, {pipeline_mode = #tpu.pipeline_mode<synchronous>, transform_indices = @transform_2, window_bounds = array<i64: 1, 64>}, {pipeline_mode = #tpu.pipeline_mode<synchronous>, transform_indices = @transform_3, window_bounds = array<i64: 64, 64>}, {pipeline_mode = #tpu.pipeline_mode<synchronous>, transform_indices = @transform_4, window_bounds = array<i64: 1, 64>}, {pipeline_mode = #tpu.pipeline_mode<synchronous>, transform_indices = @transform_5, window_bounds = array<i64: 64, 64>}, {pipeline_mode = #tpu.pipeline_mode<synchronous>, transform_indices = @transform_6, window_bounds = array<i64: 1, 64>}, {pipeline_mode = #tpu.pipeline_mode<synchronous>, transform_indices = @transform_7, window_bounds = array<i64: 64, 64>}, {pipeline_mode = #tpu.pipeline_mode<synchronous>, transform_indices = @transform_8, window_bounds = array<i64: 1, 64>}, {pipeline_mode = #tpu.pipeline_mode<synchronous>, transform_indices = @transform_9, window_bounds = array<i64: 4, 32, 64>}, {pipeline_mode = #tpu.pipeline_mode<synchronous>, transform_indices = @transform_10, window_bounds = array<i64: 4, 1, 64>}, {pipeline_mode = #tpu.pipeline_mode<synchronous>, transform_indices = @transform_11, window_bounds = array<i64: 4, 64, 64>}, {pipeline_mode = #tpu.pipeline_mode<synchronous>, transform_indices = @transform_12, window_bounds = array<i64: 4, 1, 64>}, {pipeline_mode = #tpu.pipeline_mode<synchronous>, transform_indices = @transform_13, window_bounds = array<i64: 32, 64>}, {pipeline_mode = #tpu.pipeline_mode<synchronous>, transform_indices = @transform_14, window_bounds = array<i64: 1, 64>}, {pipeline_mode = #tpu.pipeline_mode<synchronous>, transform_indices = @transform_15, window_bounds = array<i64: 64, 64>}, {pipeline_mode = #tpu.pipeline_mode<synchronous>, transform_indices = @transform_16, window_bounds = array<i64: 1, 64>}, {pipeline_mode = #tpu.pipeline_mode<synchronous>, transform_indices = @transform_17, window_bounds = array<i64: 64, 64>}, {pipeline_mode = #tpu.pipeline_mode<synchronous>, transform_indices = @transform_18, window_bounds = array<i64: 1, 64>}, {pipeline_mode = #tpu.pipeline_mode<synchronous>, transform_indices = @transform_19, window_bounds = array<i64: 64, 32>}, {pipeline_mode = #tpu.pipeline_mode<synchronous>, transform_indices = @transform_20, window_bounds = array<i64: 1, 32>}, {transform_indices = @transform_21, window_bounds = array<i64: 8, 128>}]} {
    %c0 = arith.constant 0 : index
    %c0_0 = arith.constant 0 : index
    %0 = vector.load %arg1[%c0, %c0_0] : memref<8x64xf32, #tpu.memory_space<vmem>>, vector<8x64xf32>
    %1 = vector.extract_strided_slice %0 {offsets = [0, 0], sizes = [8, 32], strides = [1, 1]} : vector<8x64xf32> to vector<8x32xf32>
    %2 = vector.extract_strided_slice %0 {offsets = [0, 32], sizes = [8, 32], strides = [1, 1]} : vector<8x64xf32> to vector<8x32xf32>
    %3 = arith.truncf %1 : vector<8x32xf32> to vector<8x32xbf16>
    %c0_1 = arith.constant 0 : index
    %c0_2 = arith.constant 0 : index
    %4 = vector.load %arg2[%c0_1, %c0_2] : memref<32x64xbf16, #tpu.memory_space<vmem>>, vector<32x64xbf16>
    %cst = arith.constant dense<0.000000e+00> : vector<8x64xf32>
    %5 = tpu.matmul %3, %4, %cst {dimension_numbers = #tpu.dot_dimension_numbers<[1], [0], [0], [1], [0, 0, 1, 1], [], []>} : vector<8x32xbf16>, vector<32x64xbf16>, vector<8x64xf32> -> vector<8x64xf32>
    %c0_3 = arith.constant 0 : index
    %c0_4 = arith.constant 0 : index
    %6 = vector.load %arg3[%c0_3, %c0_4] : memref<1x64xf32, #tpu.memory_space<vmem>>, vector<1x64xf32>
    %7 = vector.broadcast %6 : vector<1x64xf32> to vector<8x64xf32>
    %8 = arith.addf %5, %7 : vector<8x64xf32>
    %cst_5 = arith.constant 0.000000e+00 : f32
    %9 = vector.broadcast %cst_5 : f32 to vector<8x64xf32>
    %10 = arith.maximumf %8, %9 : vector<8x64xf32>
    %11 = arith.truncf %10 : vector<8x64xf32> to vector<8x64xbf16>
    %c0_6 = arith.constant 0 : index
    %c0_7 = arith.constant 0 : index
    %12 = vector.load %arg4[%c0_6, %c0_7] : memref<64x64xbf16, #tpu.memory_space<vmem>>, vector<64x64xbf16>
    %cst_8 = arith.constant dense<0.000000e+00> : vector<8x64xf32>
    %13 = tpu.matmul %11, %12, %cst_8 {dimension_numbers = #tpu.dot_dimension_numbers<[1], [0], [0], [1], [0, 0, 1, 1], [], []>} : vector<8x64xbf16>, vector<64x64xbf16>, vector<8x64xf32> -> vector<8x64xf32>
    %c0_9 = arith.constant 0 : index
    %c0_10 = arith.constant 0 : index
    %14 = vector.load %arg5[%c0_9, %c0_10] : memref<1x64xf32, #tpu.memory_space<vmem>>, vector<1x64xf32>
    %15 = vector.broadcast %14 : vector<1x64xf32> to vector<8x64xf32>
    %16 = arith.addf %13, %15 : vector<8x64xf32>
    %cst_11 = arith.constant 0.000000e+00 : f32
    %17 = vector.broadcast %cst_11 : f32 to vector<8x64xf32>
    %18 = arith.maximumf %16, %17 : vector<8x64xf32>
    %19 = arith.truncf %18 : vector<8x64xf32> to vector<8x64xbf16>
    %c0_12 = arith.constant 0 : index
    %c0_13 = arith.constant 0 : index
    %20 = vector.load %arg6[%c0_12, %c0_13] : memref<64x64xbf16, #tpu.memory_space<vmem>>, vector<64x64xbf16>
    %cst_14 = arith.constant dense<0.000000e+00> : vector<8x64xf32>
    %21 = tpu.matmul %19, %20, %cst_14 {dimension_numbers = #tpu.dot_dimension_numbers<[1], [0], [0], [1], [0, 0, 1, 1], [], []>} : vector<8x64xbf16>, vector<64x64xbf16>, vector<8x64xf32> -> vector<8x64xf32>
    %c0_15 = arith.constant 0 : index
    %c0_16 = arith.constant 0 : index
    %22 = vector.load %arg7[%c0_15, %c0_16] : memref<1x64xf32, #tpu.memory_space<vmem>>, vector<1x64xf32>
    %23 = vector.broadcast %22 : vector<1x64xf32> to vector<8x64xf32>
    %24 = arith.addf %21, %23 : vector<8x64xf32>
    %cst_17 = arith.constant 0.000000e+00 : f32
    %25 = vector.broadcast %cst_17 : f32 to vector<8x64xf32>
    %26 = arith.maximumf %24, %25 : vector<8x64xf32>
    %27 = arith.truncf %26 : vector<8x64xf32> to vector<8x64xbf16>
    %c0_18 = arith.constant 0 : index
    %c0_19 = arith.constant 0 : index
    %28 = vector.load %arg8[%c0_18, %c0_19] : memref<64x64xbf16, #tpu.memory_space<vmem>>, vector<64x64xbf16>
    %cst_20 = arith.constant dense<0.000000e+00> : vector<8x64xf32>
    %29 = tpu.matmul %27, %28, %cst_20 {dimension_numbers = #tpu.dot_dimension_numbers<[1], [0], [0], [1], [0, 0, 1, 1], [], []>} : vector<8x64xbf16>, vector<64x64xbf16>, vector<8x64xf32> -> vector<8x64xf32>
    %c0_21 = arith.constant 0 : index
    %c0_22 = arith.constant 0 : index
    %30 = vector.load %arg9[%c0_21, %c0_22] : memref<1x64xf32, #tpu.memory_space<vmem>>, vector<1x64xf32>
    %31 = vector.broadcast %30 : vector<1x64xf32> to vector<8x64xf32>
    %32 = arith.addf %29, %31 : vector<8x64xf32>
    %33 = vector.extract_strided_slice %32 {offsets = [0, 0], sizes = [8, 32], strides = [1, 1]} : vector<8x64xf32> to vector<8x32xf32>
    %34 = vector.extract_strided_slice %32 {offsets = [0, 32], sizes = [8, 32], strides = [1, 1]} : vector<8x64xf32> to vector<8x32xf32>
    %cst_23 = arith.constant 0.000000e+00 : f32
    %35 = vector.broadcast %cst_23 : f32 to vector<8x32xf32>
    %36 = arith.maximumf %34, %35 : vector<8x32xf32>
    %37 = math.absf %34 : vector<8x32xf32>
    %cst_24 = arith.constant 0.000000e+00 : f32
    %38 = vector.broadcast %cst_24 : f32 to vector<8x32xf32>
    %39 = arith.subf %38, %37 : vector<8x32xf32>
    %40 = math.exp %39 : vector<8x32xf32>
    %cst_25 = arith.constant 1.000000e+00 : f32
    %41 = vector.broadcast %cst_25 : f32 to vector<8x32xf32>
    %42 = arith.addf %41, %40 : vector<8x32xf32>
    %43 = math.log %42 : vector<8x32xf32>
    %44 = arith.addf %36, %43 : vector<8x32xf32>
    %cst_26 = arith.constant 9.99999997E-7 : f32
    %45 = vector.broadcast %cst_26 : f32 to vector<8x32xf32>
    %46 = arith.addf %44, %45 : vector<8x32xf32>
    %47 = arith.mulf %46, %2 : vector<8x32xf32>
    %48 = arith.addf %33, %47 : vector<8x32xf32>
    %cst_27 = arith.constant 0.000000e+00 : f32
    %49 = vector.broadcast %cst_27 : f32 to vector<8x1xf32>
    %50 = arith.truncf %48 : vector<8x32xf32> to vector<8x32xbf16>
    %c0_28 = arith.constant 0 : index
    %c0_29 = arith.constant 0 : index
    %c0_30 = arith.constant 0 : index
    %51 = vector.load %arg10[%c0_28, %c0_29, %c0_30] : memref<4x32x64xbf16, #tpu.memory_space<vmem>>, vector<1x32x64xbf16>
    %52 = vector.shape_cast %51 : vector<1x32x64xbf16> to vector<32x64xbf16>
    %cst_31 = arith.constant dense<0.000000e+00> : vector<8x64xf32>
    %53 = tpu.matmul %50, %52, %cst_31 {dimension_numbers = #tpu.dot_dimension_numbers<[1], [0], [0], [1], [0, 0, 1, 1], [], []>} : vector<8x32xbf16>, vector<32x64xbf16>, vector<8x64xf32> -> vector<8x64xf32>
    %c0_32 = arith.constant 0 : index
    %c0_33 = arith.constant 0 : index
    %c0_34 = arith.constant 0 : index
    %54 = vector.load %arg11[%c0_32, %c0_33, %c0_34] : memref<4x1x64xf32, #tpu.memory_space<vmem>>, vector<1x1x64xf32>
    %55 = vector.shape_cast %54 : vector<1x1x64xf32> to vector<1x64xf32>
    %56 = vector.broadcast %55 : vector<1x64xf32> to vector<8x64xf32>
    %57 = arith.addf %53, %56 : vector<8x64xf32>
    %cst_35 = arith.constant 0.000000e+00 : f32
    %58 = vector.broadcast %cst_35 : f32 to vector<8x64xf32>
    %59 = arith.maximumf %57, %58 : vector<8x64xf32>
    %60 = arith.truncf %59 : vector<8x64xf32> to vector<8x64xbf16>
    %c0_36 = arith.constant 0 : index
    %c0_37 = arith.constant 0 : index
    %c0_38 = arith.constant 0 : index
    %61 = vector.load %arg12[%c0_36, %c0_37, %c0_38] : memref<4x64x64xbf16, #tpu.memory_space<vmem>>, vector<1x64x64xbf16>
    %62 = vector.shape_cast %61 : vector<1x64x64xbf16> to vector<64x64xbf16>
    %cst_39 = arith.constant dense<0.000000e+00> : vector<8x64xf32>
    %63 = tpu.matmul %60, %62, %cst_39 {dimension_numbers = #tpu.dot_dimension_numbers<[1], [0], [0], [1], [0, 0, 1, 1], [], []>} : vector<8x64xbf16>, vector<64x64xbf16>, vector<8x64xf32> -> vector<8x64xf32>
    %c0_40 = arith.constant 0 : index
    %c0_41 = arith.constant 0 : index
    %c0_42 = arith.constant 0 : index
    %64 = vector.load %arg13[%c0_40, %c0_41, %c0_42] : memref<4x1x64xf32, #tpu.memory_space<vmem>>, vector<1x1x64xf32>
    %65 = vector.shape_cast %64 : vector<1x1x64xf32> to vector<1x64xf32>
    %66 = vector.broadcast %65 : vector<1x64xf32> to vector<8x64xf32>
    %67 = arith.addf %63, %66 : vector<8x64xf32>
    %68 = vector.extract_strided_slice %67 {offsets = [0, 0], sizes = [8, 32], strides = [1, 1]} : vector<8x64xf32> to vector<8x32xf32>
    %69 = math.tanh %68 : vector<8x32xf32>
    %70 = vector.extract_strided_slice %67 {offsets = [0, 32], sizes = [8, 32], strides = [1, 1]} : vector<8x64xf32> to vector<8x32xf32>
    %71 = math.exp %69 : vector<8x32xf32>
    %72 = arith.mulf %48, %71 : vector<8x32xf32>
    %73 = arith.addf %72, %70 : vector<8x32xf32>
    %cst_43 = arith.constant dense<0.000000e+00> : vector<8xf32>
    %74 = vector.multi_reduction <add>, %69, %cst_43 [1] : vector<8x32xf32> to vector<8xf32>
    %75 = vector.shape_cast %74 : vector<8xf32> to vector<8x1xf32>
    %76 = arith.addf %49, %75 : vector<8x1xf32>
    %77 = arith.truncf %73 : vector<8x32xf32> to vector<8x32xbf16>
    %c1 = arith.constant 1 : index
    %c0_44 = arith.constant 0 : index
    %c0_45 = arith.constant 0 : index
    %78 = vector.load %arg10[%c1, %c0_44, %c0_45] : memref<4x32x64xbf16, #tpu.memory_space<vmem>>, vector<1x32x64xbf16>
    %79 = vector.shape_cast %78 : vector<1x32x64xbf16> to vector<32x64xbf16>
    %cst_46 = arith.constant dense<0.000000e+00> : vector<8x64xf32>
    %80 = tpu.matmul %77, %79, %cst_46 {dimension_numbers = #tpu.dot_dimension_numbers<[1], [0], [0], [1], [0, 0, 1, 1], [], []>} : vector<8x32xbf16>, vector<32x64xbf16>, vector<8x64xf32> -> vector<8x64xf32>
    %c1_47 = arith.constant 1 : index
    %c0_48 = arith.constant 0 : index
    %c0_49 = arith.constant 0 : index
    %81 = vector.load %arg11[%c1_47, %c0_48, %c0_49] : memref<4x1x64xf32, #tpu.memory_space<vmem>>, vector<1x1x64xf32>
    %82 = vector.shape_cast %81 : vector<1x1x64xf32> to vector<1x64xf32>
    %83 = vector.broadcast %82 : vector<1x64xf32> to vector<8x64xf32>
    %84 = arith.addf %80, %83 : vector<8x64xf32>
    %cst_50 = arith.constant 0.000000e+00 : f32
    %85 = vector.broadcast %cst_50 : f32 to vector<8x64xf32>
    %86 = arith.maximumf %84, %85 : vector<8x64xf32>
    %87 = arith.truncf %86 : vector<8x64xf32> to vector<8x64xbf16>
    %c1_51 = arith.constant 1 : index
    %c0_52 = arith.constant 0 : index
    %c0_53 = arith.constant 0 : index
    %88 = vector.load %arg12[%c1_51, %c0_52, %c0_53] : memref<4x64x64xbf16, #tpu.memory_space<vmem>>, vector<1x64x64xbf16>
    %89 = vector.shape_cast %88 : vector<1x64x64xbf16> to vector<64x64xbf16>
    %cst_54 = arith.constant dense<0.000000e+00> : vector<8x64xf32>
    %90 = tpu.matmul %87, %89, %cst_54 {dimension_numbers = #tpu.dot_dimension_numbers<[1], [0], [0], [1], [0, 0, 1, 1], [], []>} : vector<8x64xbf16>, vector<64x64xbf16>, vector<8x64xf32> -> vector<8x64xf32>
    %c1_55 = arith.constant 1 : index
    %c0_56 = arith.constant 0 : index
    %c0_57 = arith.constant 0 : index
    %91 = vector.load %arg13[%c1_55, %c0_56, %c0_57] : memref<4x1x64xf32, #tpu.memory_space<vmem>>, vector<1x1x64xf32>
    %92 = vector.shape_cast %91 : vector<1x1x64xf32> to vector<1x64xf32>
    %93 = vector.broadcast %92 : vector<1x64xf32> to vector<8x64xf32>
    %94 = arith.addf %90, %93 : vector<8x64xf32>
    %95 = vector.extract_strided_slice %94 {offsets = [0, 0], sizes = [8, 32], strides = [1, 1]} : vector<8x64xf32> to vector<8x32xf32>
    %96 = math.tanh %95 : vector<8x32xf32>
    %97 = vector.extract_strided_slice %94 {offsets = [0, 32], sizes = [8, 32], strides = [1, 1]} : vector<8x64xf32> to vector<8x32xf32>
    %98 = math.exp %96 : vector<8x32xf32>
    %99 = arith.mulf %73, %98 : vector<8x32xf32>
    %100 = arith.addf %99, %97 : vector<8x32xf32>
    %cst_58 = arith.constant dense<0.000000e+00> : vector<8xf32>
    %101 = vector.multi_reduction <add>, %96, %cst_58 [1] : vector<8x32xf32> to vector<8xf32>
    %102 = vector.shape_cast %101 : vector<8xf32> to vector<8x1xf32>
    %103 = arith.addf %76, %102 : vector<8x1xf32>
    %104 = arith.truncf %100 : vector<8x32xf32> to vector<8x32xbf16>
    %c2 = arith.constant 2 : index
    %c0_59 = arith.constant 0 : index
    %c0_60 = arith.constant 0 : index
    %105 = vector.load %arg10[%c2, %c0_59, %c0_60] : memref<4x32x64xbf16, #tpu.memory_space<vmem>>, vector<1x32x64xbf16>
    %106 = vector.shape_cast %105 : vector<1x32x64xbf16> to vector<32x64xbf16>
    %cst_61 = arith.constant dense<0.000000e+00> : vector<8x64xf32>
    %107 = tpu.matmul %104, %106, %cst_61 {dimension_numbers = #tpu.dot_dimension_numbers<[1], [0], [0], [1], [0, 0, 1, 1], [], []>} : vector<8x32xbf16>, vector<32x64xbf16>, vector<8x64xf32> -> vector<8x64xf32>
    %c2_62 = arith.constant 2 : index
    %c0_63 = arith.constant 0 : index
    %c0_64 = arith.constant 0 : index
    %108 = vector.load %arg11[%c2_62, %c0_63, %c0_64] : memref<4x1x64xf32, #tpu.memory_space<vmem>>, vector<1x1x64xf32>
    %109 = vector.shape_cast %108 : vector<1x1x64xf32> to vector<1x64xf32>
    %110 = vector.broadcast %109 : vector<1x64xf32> to vector<8x64xf32>
    %111 = arith.addf %107, %110 : vector<8x64xf32>
    %cst_65 = arith.constant 0.000000e+00 : f32
    %112 = vector.broadcast %cst_65 : f32 to vector<8x64xf32>
    %113 = arith.maximumf %111, %112 : vector<8x64xf32>
    %114 = arith.truncf %113 : vector<8x64xf32> to vector<8x64xbf16>
    %c2_66 = arith.constant 2 : index
    %c0_67 = arith.constant 0 : index
    %c0_68 = arith.constant 0 : index
    %115 = vector.load %arg12[%c2_66, %c0_67, %c0_68] : memref<4x64x64xbf16, #tpu.memory_space<vmem>>, vector<1x64x64xbf16>
    %116 = vector.shape_cast %115 : vector<1x64x64xbf16> to vector<64x64xbf16>
    %cst_69 = arith.constant dense<0.000000e+00> : vector<8x64xf32>
    %117 = tpu.matmul %114, %116, %cst_69 {dimension_numbers = #tpu.dot_dimension_numbers<[1], [0], [0], [1], [0, 0, 1, 1], [], []>} : vector<8x64xbf16>, vector<64x64xbf16>, vector<8x64xf32> -> vector<8x64xf32>
    %c2_70 = arith.constant 2 : index
    %c0_71 = arith.constant 0 : index
    %c0_72 = arith.constant 0 : index
    %118 = vector.load %arg13[%c2_70, %c0_71, %c0_72] : memref<4x1x64xf32, #tpu.memory_space<vmem>>, vector<1x1x64xf32>
    %119 = vector.shape_cast %118 : vector<1x1x64xf32> to vector<1x64xf32>
    %120 = vector.broadcast %119 : vector<1x64xf32> to vector<8x64xf32>
    %121 = arith.addf %117, %120 : vector<8x64xf32>
    %122 = vector.extract_strided_slice %121 {offsets = [0, 0], sizes = [8, 32], strides = [1, 1]} : vector<8x64xf32> to vector<8x32xf32>
    %123 = math.tanh %122 : vector<8x32xf32>
    %124 = vector.extract_strided_slice %121 {offsets = [0, 32], sizes = [8, 32], strides = [1, 1]} : vector<8x64xf32> to vector<8x32xf32>
    %125 = math.exp %123 : vector<8x32xf32>
    %126 = arith.mulf %100, %125 : vector<8x32xf32>
    %127 = arith.addf %126, %124 : vector<8x32xf32>
    %cst_73 = arith.constant dense<0.000000e+00> : vector<8xf32>
    %128 = vector.multi_reduction <add>, %123, %cst_73 [1] : vector<8x32xf32> to vector<8xf32>
    %129 = vector.shape_cast %128 : vector<8xf32> to vector<8x1xf32>
    %130 = arith.addf %103, %129 : vector<8x1xf32>
    %131 = arith.truncf %127 : vector<8x32xf32> to vector<8x32xbf16>
    %c3 = arith.constant 3 : index
    %c0_74 = arith.constant 0 : index
    %c0_75 = arith.constant 0 : index
    %132 = vector.load %arg10[%c3, %c0_74, %c0_75] : memref<4x32x64xbf16, #tpu.memory_space<vmem>>, vector<1x32x64xbf16>
    %133 = vector.shape_cast %132 : vector<1x32x64xbf16> to vector<32x64xbf16>
    %cst_76 = arith.constant dense<0.000000e+00> : vector<8x64xf32>
    %134 = tpu.matmul %131, %133, %cst_76 {dimension_numbers = #tpu.dot_dimension_numbers<[1], [0], [0], [1], [0, 0, 1, 1], [], []>} : vector<8x32xbf16>, vector<32x64xbf16>, vector<8x64xf32> -> vector<8x64xf32>
    %c3_77 = arith.constant 3 : index
    %c0_78 = arith.constant 0 : index
    %c0_79 = arith.constant 0 : index
    %135 = vector.load %arg11[%c3_77, %c0_78, %c0_79] : memref<4x1x64xf32, #tpu.memory_space<vmem>>, vector<1x1x64xf32>
    %136 = vector.shape_cast %135 : vector<1x1x64xf32> to vector<1x64xf32>
    %137 = vector.broadcast %136 : vector<1x64xf32> to vector<8x64xf32>
    %138 = arith.addf %134, %137 : vector<8x64xf32>
    %cst_80 = arith.constant 0.000000e+00 : f32
    %139 = vector.broadcast %cst_80 : f32 to vector<8x64xf32>
    %140 = arith.maximumf %138, %139 : vector<8x64xf32>
    %141 = arith.truncf %140 : vector<8x64xf32> to vector<8x64xbf16>
    %c3_81 = arith.constant 3 : index
    %c0_82 = arith.constant 0 : index
    %c0_83 = arith.constant 0 : index
    %142 = vector.load %arg12[%c3_81, %c0_82, %c0_83] : memref<4x64x64xbf16, #tpu.memory_space<vmem>>, vector<1x64x64xbf16>
    %143 = vector.shape_cast %142 : vector<1x64x64xbf16> to vector<64x64xbf16>
    %cst_84 = arith.constant dense<0.000000e+00> : vector<8x64xf32>
    %144 = tpu.matmul %141, %143, %cst_84 {dimension_numbers = #tpu.dot_dimension_numbers<[1], [0], [0], [1], [0, 0, 1, 1], [], []>} : vector<8x64xbf16>, vector<64x64xbf16>, vector<8x64xf32> -> vector<8x64xf32>
    %c3_85 = arith.constant 3 : index
    %c0_86 = arith.constant 0 : index
    %c0_87 = arith.constant 0 : index
    %145 = vector.load %arg13[%c3_85, %c0_86, %c0_87] : memref<4x1x64xf32, #tpu.memory_space<vmem>>, vector<1x1x64xf32>
    %146 = vector.shape_cast %145 : vector<1x1x64xf32> to vector<1x64xf32>
    %147 = vector.broadcast %146 : vector<1x64xf32> to vector<8x64xf32>
    %148 = arith.addf %144, %147 : vector<8x64xf32>
    %149 = vector.extract_strided_slice %148 {offsets = [0, 0], sizes = [8, 32], strides = [1, 1]} : vector<8x64xf32> to vector<8x32xf32>
    %150 = math.tanh %149 : vector<8x32xf32>
    %151 = vector.extract_strided_slice %148 {offsets = [0, 32], sizes = [8, 32], strides = [1, 1]} : vector<8x64xf32> to vector<8x32xf32>
    %152 = math.exp %150 : vector<8x32xf32>
    %153 = arith.mulf %127, %152 : vector<8x32xf32>
    %154 = arith.addf %153, %151 : vector<8x32xf32>
    %cst_88 = arith.constant dense<0.000000e+00> : vector<8xf32>
    %155 = vector.multi_reduction <add>, %150, %cst_88 [1] : vector<8x32xf32> to vector<8xf32>
    %156 = vector.shape_cast %155 : vector<8xf32> to vector<8x1xf32>
    %157 = arith.addf %130, %156 : vector<8x1xf32>
    %158 = arith.truncf %154 : vector<8x32xf32> to vector<8x32xbf16>
    %c0_89 = arith.constant 0 : index
    %c0_90 = arith.constant 0 : index
    %159 = vector.load %arg14[%c0_89, %c0_90] : memref<32x64xbf16, #tpu.memory_space<vmem>>, vector<32x64xbf16>
    %cst_91 = arith.constant dense<0.000000e+00> : vector<8x64xf32>
    %160 = tpu.matmul %158, %159, %cst_91 {dimension_numbers = #tpu.dot_dimension_numbers<[1], [0], [0], [1], [0, 0, 1, 1], [], []>} : vector<8x32xbf16>, vector<32x64xbf16>, vector<8x64xf32> -> vector<8x64xf32>
    %c0_92 = arith.constant 0 : index
    %c0_93 = arith.constant 0 : index
    %161 = vector.load %arg15[%c0_92, %c0_93] : memref<1x64xf32, #tpu.memory_space<vmem>>, vector<1x64xf32>
    %162 = vector.broadcast %161 : vector<1x64xf32> to vector<8x64xf32>
    %163 = arith.addf %160, %162 : vector<8x64xf32>
    %cst_94 = arith.constant 0.000000e+00 : f32
    %164 = vector.broadcast %cst_94 : f32 to vector<8x64xf32>
    %165 = arith.maximumf %163, %164 : vector<8x64xf32>
    %166 = arith.truncf %165 : vector<8x64xf32> to vector<8x64xbf16>
    %c0_95 = arith.constant 0 : index
    %c0_96 = arith.constant 0 : index
    %167 = vector.load %arg16[%c0_95, %c0_96] : memref<64x64xbf16, #tpu.memory_space<vmem>>, vector<64x64xbf16>
    %cst_97 = arith.constant dense<0.000000e+00> : vector<8x64xf32>
    %168 = tpu.matmul %166, %167, %cst_97 {dimension_numbers = #tpu.dot_dimension_numbers<[1], [0], [0], [1], [0, 0, 1, 1], [], []>} : vector<8x64xbf16>, vector<64x64xbf16>, vector<8x64xf32> -> vector<8x64xf32>
    %c0_98 = arith.constant 0 : index
    %c0_99 = arith.constant 0 : index
    %169 = vector.load %arg17[%c0_98, %c0_99] : memref<1x64xf32, #tpu.memory_space<vmem>>, vector<1x64xf32>
    %170 = vector.broadcast %169 : vector<1x64xf32> to vector<8x64xf32>
    %171 = arith.addf %168, %170 : vector<8x64xf32>
    %cst_100 = arith.constant 0.000000e+00 : f32
    %172 = vector.broadcast %cst_100 : f32 to vector<8x64xf32>
    %173 = arith.maximumf %171, %172 : vector<8x64xf32>
    %174 = arith.truncf %173 : vector<8x64xf32> to vector<8x64xbf16>
    %c0_101 = arith.constant 0 : index
    %c0_102 = arith.constant 0 : index
    %175 = vector.load %arg18[%c0_101, %c0_102] : memref<64x64xbf16, #tpu.memory_space<vmem>>, vector<64x64xbf16>
    %cst_103 = arith.constant dense<0.000000e+00> : vector<8x64xf32>
    %176 = tpu.matmul %174, %175, %cst_103 {dimension_numbers = #tpu.dot_dimension_numbers<[1], [0], [0], [1], [0, 0, 1, 1], [], []>} : vector<8x64xbf16>, vector<64x64xbf16>, vector<8x64xf32> -> vector<8x64xf32>
    %c0_104 = arith.constant 0 : index
    %c0_105 = arith.constant 0 : index
    %177 = vector.load %arg19[%c0_104, %c0_105] : memref<1x64xf32, #tpu.memory_space<vmem>>, vector<1x64xf32>
    %178 = vector.broadcast %177 : vector<1x64xf32> to vector<8x64xf32>
    %179 = arith.addf %176, %178 : vector<8x64xf32>
    %cst_106 = arith.constant 0.000000e+00 : f32
    %180 = vector.broadcast %cst_106 : f32 to vector<8x64xf32>
    %181 = arith.maximumf %179, %180 : vector<8x64xf32>
    %182 = arith.truncf %181 : vector<8x64xf32> to vector<8x64xbf16>
    %c0_107 = arith.constant 0 : index
    %c0_108 = arith.constant 0 : index
    %183 = vector.load %arg20[%c0_107, %c0_108] : memref<64x32xbf16, #tpu.memory_space<vmem>>, vector<64x32xbf16>
    %cst_109 = arith.constant dense<0.000000e+00> : vector<8x32xf32>
    %184 = tpu.matmul %182, %183, %cst_109 {dimension_numbers = #tpu.dot_dimension_numbers<[1], [0], [0], [1], [0, 0, 1, 1], [], []>} : vector<8x64xbf16>, vector<64x32xbf16>, vector<8x32xf32> -> vector<8x32xf32>
    %c0_110 = arith.constant 0 : index
    %c0_111 = arith.constant 0 : index
    %185 = vector.load %arg21[%c0_110, %c0_111] : memref<1x32xf32, #tpu.memory_space<vmem>>, vector<1x32xf32>
    %186 = vector.broadcast %185 : vector<1x32xf32> to vector<8x32xf32>
    %187 = arith.addf %184, %186 : vector<8x32xf32>
    %c0_112 = arith.constant 0 : index
    %c0_113 = arith.constant 0 : index
    %188 = vector.load %arg22[%c0_112, %c0_113] : memref<8x128xf32, #tpu.memory_space<vmem>>, vector<8x32xf32>
    tpu.vector_store %arg22[%c0_112, %c0_113], %187 {strides = array<i32>} : memref<8x128xf32, #tpu.memory_space<vmem>>, vector<8x32xf32>,
    %c0_114 = arith.constant 0 : index
    %c32 = arith.constant 32 : index
    %189 = vector.load %arg22[%c0_114, %c32] : memref<8x128xf32, #tpu.memory_space<vmem>>, vector<8x32xf32>
    tpu.vector_store %arg22[%c0_114, %c32], %33 {strides = array<i32>} : memref<8x128xf32, #tpu.memory_space<vmem>>, vector<8x32xf32>,
    %c0_115 = arith.constant 0 : index
    %c64 = arith.constant 64 : index
    %190 = vector.load %arg22[%c0_115, %c64] : memref<8x128xf32, #tpu.memory_space<vmem>>, vector<8x32xf32>
    tpu.vector_store %arg22[%c0_115, %c64], %46 {strides = array<i32>} : memref<8x128xf32, #tpu.memory_space<vmem>>, vector<8x32xf32>,
    %c0_116 = arith.constant 0 : index
    %c96 = arith.constant 96 : index
    %191 = vector.load %arg22[%c0_116, %c96] : memref<8x128xf32, #tpu.memory_space<vmem>>, vector<8x1xf32>
    tpu.vector_store %arg22[%c0_116, %c96], %157 {strides = array<i32>} : memref<8x128xf32, #tpu.memory_space<vmem>>, vector<8x1xf32>,
    return
  }
  func.func @transform_0(%arg0: i32) -> (i32, i32) {
    %c0_i32 = arith.constant 0 : i32
    %c0_i32_0 = arith.constant 0 : i32
    return %arg0, %c0_i32 : i32, i32
  }
  func.func @transform_1(%arg0: i32) -> (i32, i32) {
    %c0_i32 = arith.constant 0 : i32
    %c0_i32_0 = arith.constant 0 : i32
    %c0_i32_1 = arith.constant 0 : i32
    return %c0_i32, %c0_i32_0 : i32, i32
  }
  func.func @transform_2(%arg0: i32) -> (i32, i32) {
    %c0_i32 = arith.constant 0 : i32
    %c0_i32_0 = arith.constant 0 : i32
    %c0_i32_1 = arith.constant 0 : i32
    return %c0_i32, %c0_i32_0 : i32, i32
  }
  func.func @transform_3(%arg0: i32) -> (i32, i32) {
    %c0_i32 = arith.constant 0 : i32
    %c0_i32_0 = arith.constant 0 : i32
    %c0_i32_1 = arith.constant 0 : i32
    return %c0_i32, %c0_i32_0 : i32, i32
  }
  func.func @transform_4(%arg0: i32) -> (i32, i32) {
    %c0_i32 = arith.constant 0 : i32
    %c0_i32_0 = arith.constant 0 : i32
    %c0_i32_1 = arith.constant 0 : i32
    return %c0_i32, %c0_i32_0 : i32, i32
  }
  func.func @transform_5(%arg0: i32) -> (i32, i32) {
    %c0_i32 = arith.constant 0 : i32
    %c0_i32_0 = arith.constant 0 : i32
    %c0_i32_1 = arith.constant 0 : i32
    return %c0_i32, %c0_i32_0 : i32, i32
  }
  func.func @transform_6(%arg0: i32) -> (i32, i32) {
    %c0_i32 = arith.constant 0 : i32
    %c0_i32_0 = arith.constant 0 : i32
    %c0_i32_1 = arith.constant 0 : i32
    return %c0_i32, %c0_i32_0 : i32, i32
  }
  func.func @transform_7(%arg0: i32) -> (i32, i32) {
    %c0_i32 = arith.constant 0 : i32
    %c0_i32_0 = arith.constant 0 : i32
    %c0_i32_1 = arith.constant 0 : i32
    return %c0_i32, %c0_i32_0 : i32, i32
  }
  func.func @transform_8(%arg0: i32) -> (i32, i32) {
    %c0_i32 = arith.constant 0 : i32
    %c0_i32_0 = arith.constant 0 : i32
    %c0_i32_1 = arith.constant 0 : i32
    return %c0_i32, %c0_i32_0 : i32, i32
  }
  func.func @transform_9(%arg0: i32) -> (i32, i32, i32) {
    %c0_i32 = arith.constant 0 : i32
    %c0_i32_0 = arith.constant 0 : i32
    %c0_i32_1 = arith.constant 0 : i32
    %c0_i32_2 = arith.constant 0 : i32
    return %c0_i32, %c0_i32_0, %c0_i32_1 : i32, i32, i32
  }
  func.func @transform_10(%arg0: i32) -> (i32, i32, i32) {
    %c0_i32 = arith.constant 0 : i32
    %c0_i32_0 = arith.constant 0 : i32
    %c0_i32_1 = arith.constant 0 : i32
    %c0_i32_2 = arith.constant 0 : i32
    return %c0_i32, %c0_i32_0, %c0_i32_1 : i32, i32, i32
  }
  func.func @transform_11(%arg0: i32) -> (i32, i32, i32) {
    %c0_i32 = arith.constant 0 : i32
    %c0_i32_0 = arith.constant 0 : i32
    %c0_i32_1 = arith.constant 0 : i32
    %c0_i32_2 = arith.constant 0 : i32
    return %c0_i32, %c0_i32_0, %c0_i32_1 : i32, i32, i32
  }
  func.func @transform_12(%arg0: i32) -> (i32, i32, i32) {
    %c0_i32 = arith.constant 0 : i32
    %c0_i32_0 = arith.constant 0 : i32
    %c0_i32_1 = arith.constant 0 : i32
    %c0_i32_2 = arith.constant 0 : i32
    return %c0_i32, %c0_i32_0, %c0_i32_1 : i32, i32, i32
  }
  func.func @transform_13(%arg0: i32) -> (i32, i32) {
    %c0_i32 = arith.constant 0 : i32
    %c0_i32_0 = arith.constant 0 : i32
    %c0_i32_1 = arith.constant 0 : i32
    return %c0_i32, %c0_i32_0 : i32, i32
  }
  func.func @transform_14(%arg0: i32) -> (i32, i32) {
    %c0_i32 = arith.constant 0 : i32
    %c0_i32_0 = arith.constant 0 : i32
    %c0_i32_1 = arith.constant 0 : i32
    return %c0_i32, %c0_i32_0 : i32, i32
  }
  func.func @transform_15(%arg0: i32) -> (i32, i32) {
    %c0_i32 = arith.constant 0 : i32
    %c0_i32_0 = arith.constant 0 : i32
    %c0_i32_1 = arith.constant 0 : i32
    return %c0_i32, %c0_i32_0 : i32, i32
  }
  func.func @transform_16(%arg0: i32) -> (i32, i32) {
    %c0_i32 = arith.constant 0 : i32
    %c0_i32_0 = arith.constant 0 : i32
    %c0_i32_1 = arith.constant 0 : i32
    return %c0_i32, %c0_i32_0 : i32, i32
  }
  func.func @transform_17(%arg0: i32) -> (i32, i32) {
    %c0_i32 = arith.constant 0 : i32
    %c0_i32_0 = arith.constant 0 : i32
    %c0_i32_1 = arith.constant 0 : i32
    return %c0_i32, %c0_i32_0 : i32, i32
  }
  func.func @transform_18(%arg0: i32) -> (i32, i32) {
    %c0_i32 = arith.constant 0 : i32
    %c0_i32_0 = arith.constant 0 : i32
    %c0_i32_1 = arith.constant 0 : i32
    return %c0_i32, %c0_i32_0 : i32, i32
  }
  func.func @transform_19(%arg0: i32) -> (i32, i32) {
    %c0_i32 = arith.constant 0 : i32
    %c0_i32_0 = arith.constant 0 : i32
    %c0_i32_1 = arith.constant 0 : i32
    return %c0_i32, %c0_i32_0 : i32, i32
  }
  func.func @transform_20(%arg0: i32) -> (i32, i32) {
    %c0_i32 = arith.constant 0 : i32
    %c0_i32_0 = arith.constant 0 : i32
    %c0_i32_1 = arith.constant 0 : i32
    return %c0_i32, %c0_i32_0 : i32, i32
  }
  func.func @transform_21(%arg0: i32) -> (i32, i32) {
    %c0_i32 = arith.constant 0 : i32
    %c0_i32_0 = arith.constant 0 : i32
    return %arg0, %c0_i32 : i32, i32
  }
}

module attributes {stable_mosaic.version = 11 : i64} {
  func.func @_flow_vae_kernel(%arg0: i32, %arg1: memref<8x64xf32, #tpu.memory_space<vmem>>, %arg2: memref<32x64xbf16, #tpu.memory_space<vmem>>, %arg3: memref<1x64xf32, #tpu.memory_space<vmem>>, %arg4: memref<64x64xbf16, #tpu.memory_space<vmem>>, %arg5: memref<1x64xf32, #tpu.memory_space<vmem>>, %arg6: memref<64x64xbf16, #tpu.memory_space<vmem>>, %arg7: memref<1x64xf32, #tpu.memory_space<vmem>>, %arg8: memref<64x64xbf16, #tpu.memory_space<vmem>>, %arg9: memref<1x64xf32, #tpu.memory_space<vmem>>, %arg10: memref<4x32x64xbf16, #tpu.memory_space<vmem>>, %arg11: memref<4x1x64xf32, #tpu.memory_space<vmem>>, %arg12: memref<4x64x64xbf16, #tpu.memory_space<vmem>>, %arg13: memref<4x1x64xf32, #tpu.memory_space<vmem>>, %arg14: memref<32x64xbf16, #tpu.memory_space<vmem>>, %arg15: memref<1x64xf32, #tpu.memory_space<vmem>>, %arg16: memref<64x64xbf16, #tpu.memory_space<vmem>>, %arg17: memref<1x64xf32, #tpu.memory_space<vmem>>, %arg18: memref<64x64xbf16, #tpu.memory_space<vmem>>, %arg19: memref<1x64xf32, #tpu.memory_space<vmem>>, %arg20: memref<64x32xbf16, #tpu.memory_space<vmem>>, %arg21: memref<1x32xf32, #tpu.memory_space<vmem>>, %arg22: memref<8x128xf32, #tpu.memory_space<vmem>>) attributes {dimension_semantics = [#tpu.dimension_semantics<parallel>], iteration_bounds = array<i64: 1>, scalar_prefetch = 0 : i64, scratch_operands = 0 : i64, tpu.core_type = #tpu.core_type<tc>, window_params = [{transform_indices = @transform_0, window_bounds = array<i64: 8, 64>}, {pipeline_mode = #tpu.pipeline_mode<synchronous>, transform_indices = @transform_1, window_bounds = array<i64: 32, 64>}, {pipeline_mode = #tpu.pipeline_mode<synchronous>, transform_indices = @transform_2, window_bounds = array<i64: 1, 64>}, {pipeline_mode = #tpu.pipeline_mode<synchronous>, transform_indices = @transform_3, window_bounds = array<i64: 64, 64>}, {pipeline_mode = #tpu.pipeline_mode<synchronous>, transform_indices = @transform_4, window_bounds = array<i64: 1, 64>}, {pipeline_mode = #tpu.pipeline_mode<synchronous>, transform_indices = @transform_5, window_bounds = array<i64: 64, 64>}, {pipeline_mode = #tpu.pipeline_mode<synchronous>, transform_indices = @transform_6, window_bounds = array<i64: 1, 64>}, {pipeline_mode = #tpu.pipeline_mode<synchronous>, transform_indices = @transform_7, window_bounds = array<i64: 64, 64>}, {pipeline_mode = #tpu.pipeline_mode<synchronous>, transform_indices = @transform_8, window_bounds = array<i64: 1, 64>}, {pipeline_mode = #tpu.pipeline_mode<synchronous>, transform_indices = @transform_9, window_bounds = array<i64: 4, 32, 64>}, {pipeline_mode = #tpu.pipeline_mode<synchronous>, transform_indices = @transform_10, window_bounds = array<i64: 4, 1, 64>}, {pipeline_mode = #tpu.pipeline_mode<synchronous>, transform_indices = @transform_11, window_bounds = array<i64: 4, 64, 64>}, {pipeline_mode = #tpu.pipeline_mode<synchronous>, transform_indices = @transform_12, window_bounds = array<i64: 4, 1, 64>}, {pipeline_mode = #tpu.pipeline_mode<synchronous>, transform_indices = @transform_13, window_bounds = array<i64: 32, 64>}, {pipeline_mode = #tpu.pipeline_mode<synchronous>, transform_indices = @transform_14, window_bounds = array<i64: 1, 64>}, {pipeline_mode = #tpu.pipeline_mode<synchronous>, transform_indices = @transform_15, window_bounds = array<i64: 64, 64>}, {pipeline_mode = #tpu.pipeline_mode<synchronous>, transform_indices = @transform_16, window_bounds = array<i64: 1, 64>}, {pipeline_mode = #tpu.pipeline_mode<synchronous>, transform_indices = @transform_17, window_bounds = array<i64: 64, 64>}, {pipeline_mode = #tpu.pipeline_mode<synchronous>, transform_indices = @transform_18, window_bounds = array<i64: 1, 64>}, {pipeline_mode = #tpu.pipeline_mode<synchronous>, transform_indices = @transform_19, window_bounds = array<i64: 64, 32>}, {pipeline_mode = #tpu.pipeline_mode<synchronous>, transform_indices = @transform_20, window_bounds = array<i64: 1, 32>}, {transform_indices = @transform_21, window_bounds = array<i64: 8, 128>}]} {
    %c0 = arith.constant 0 : index
    %c0_0 = arith.constant 0 : index
    %0 = vector.load %arg1[%c0, %c0_0] : memref<8x64xf32, #tpu.memory_space<vmem>>, vector<8x64xf32>
    %1 = vector.extract_strided_slice %0 {offsets = [0, 0], sizes = [8, 32], strides = [1, 1]} : vector<8x64xf32> to vector<8x32xf32>
    %2 = vector.extract_strided_slice %0 {offsets = [0, 32], sizes = [8, 32], strides = [1, 1]} : vector<8x64xf32> to vector<8x32xf32>
    %3 = arith.truncf %1 : vector<8x32xf32> to vector<8x32xbf16>
    %c0_1 = arith.constant 0 : index
    %c0_2 = arith.constant 0 : index
    %4 = vector.load %arg2[%c0_1, %c0_2] : memref<32x64xbf16, #tpu.memory_space<vmem>>, vector<32x64xbf16>
    %cst = arith.constant dense<0.000000e+00> : vector<8x64xf32>
    %5 = tpu.matmul %3, %4, %cst {dimension_numbers = #tpu.dot_dimension_numbers<[1], [0], [0], [1], [0, 0, 1, 1], [], []>} : vector<8x32xbf16>, vector<32x64xbf16>, vector<8x64xf32> -> vector<8x64xf32>
    %c0_3 = arith.constant 0 : index
    %c0_4 = arith.constant 0 : index
    %6 = vector.load %arg3[%c0_3, %c0_4] : memref<1x64xf32, #tpu.memory_space<vmem>>, vector<1x64xf32>
    %7 = vector.broadcast %6 : vector<1x64xf32> to vector<8x64xf32>
    %8 = arith.addf %5, %7 : vector<8x64xf32>
    %cst_5 = arith.constant 0.000000e+00 : f32
    %9 = vector.broadcast %cst_5 : f32 to vector<8x64xf32>
    %10 = arith.maximumf %8, %9 : vector<8x64xf32>
    %11 = arith.truncf %10 : vector<8x64xf32> to vector<8x64xbf16>
    %c0_6 = arith.constant 0 : index
    %c0_7 = arith.constant 0 : index
    %12 = vector.load %arg4[%c0_6, %c0_7] : memref<64x64xbf16, #tpu.memory_space<vmem>>, vector<64x64xbf16>
    %cst_8 = arith.constant dense<0.000000e+00> : vector<8x64xf32>
    %13 = tpu.matmul %11, %12, %cst_8 {dimension_numbers = #tpu.dot_dimension_numbers<[1], [0], [0], [1], [0, 0, 1, 1], [], []>} : vector<8x64xbf16>, vector<64x64xbf16>, vector<8x64xf32> -> vector<8x64xf32>
    %c0_9 = arith.constant 0 : index
    %c0_10 = arith.constant 0 : index
    %14 = vector.load %arg5[%c0_9, %c0_10] : memref<1x64xf32, #tpu.memory_space<vmem>>, vector<1x64xf32>
    %15 = vector.broadcast %14 : vector<1x64xf32> to vector<8x64xf32>
    %16 = arith.addf %13, %15 : vector<8x64xf32>
    %cst_11 = arith.constant 0.000000e+00 : f32
    %17 = vector.broadcast %cst_11 : f32 to vector<8x64xf32>
    %18 = arith.maximumf %16, %17 : vector<8x64xf32>
    %19 = arith.truncf %18 : vector<8x64xf32> to vector<8x64xbf16>
    %c0_12 = arith.constant 0 : index
    %c0_13 = arith.constant 0 : index
    %20 = vector.load %arg6[%c0_12, %c0_13] : memref<64x64xbf16, #tpu.memory_space<vmem>>, vector<64x64xbf16>
    %cst_14 = arith.constant dense<0.000000e+00> : vector<8x64xf32>
    %21 = tpu.matmul %19, %20, %cst_14 {dimension_numbers = #tpu.dot_dimension_numbers<[1], [0], [0], [1], [0, 0, 1, 1], [], []>} : vector<8x64xbf16>, vector<64x64xbf16>, vector<8x64xf32> -> vector<8x64xf32>
    %c0_15 = arith.constant 0 : index
    %c0_16 = arith.constant 0 : index
    %22 = vector.load %arg7[%c0_15, %c0_16] : memref<1x64xf32, #tpu.memory_space<vmem>>, vector<1x64xf32>
    %23 = vector.broadcast %22 : vector<1x64xf32> to vector<8x64xf32>
    %24 = arith.addf %21, %23 : vector<8x64xf32>
    %cst_17 = arith.constant 0.000000e+00 : f32
    %25 = vector.broadcast %cst_17 : f32 to vector<8x64xf32>
    %26 = arith.maximumf %24, %25 : vector<8x64xf32>
    %27 = arith.truncf %26 : vector<8x64xf32> to vector<8x64xbf16>
    %c0_18 = arith.constant 0 : index
    %c0_19 = arith.constant 0 : index
    %28 = vector.load %arg8[%c0_18, %c0_19] : memref<64x64xbf16, #tpu.memory_space<vmem>>, vector<64x64xbf16>
    %cst_20 = arith.constant dense<0.000000e+00> : vector<8x64xf32>
    %29 = tpu.matmul %27, %28, %cst_20 {dimension_numbers = #tpu.dot_dimension_numbers<[1], [0], [0], [1], [0, 0, 1, 1], [], []>} : vector<8x64xbf16>, vector<64x64xbf16>, vector<8x64xf32> -> vector<8x64xf32>
    %c0_21 = arith.constant 0 : index
    %c0_22 = arith.constant 0 : index
    %30 = vector.load %arg9[%c0_21, %c0_22] : memref<1x64xf32, #tpu.memory_space<vmem>>, vector<1x64xf32>
    %31 = vector.broadcast %30 : vector<1x64xf32> to vector<8x64xf32>
    %32 = arith.addf %29, %31 : vector<8x64xf32>
    %33 = vector.extract_strided_slice %32 {offsets = [0, 0], sizes = [8, 32], strides = [1, 1]} : vector<8x64xf32> to vector<8x32xf32>
    %34 = vector.extract_strided_slice %32 {offsets = [0, 32], sizes = [8, 32], strides = [1, 1]} : vector<8x64xf32> to vector<8x32xf32>
    %cst_23 = arith.constant 0.000000e+00 : f32
    %35 = vector.broadcast %cst_23 : f32 to vector<8x32xf32>
    %36 = arith.maximumf %34, %35 : vector<8x32xf32>
    %37 = math.absf %34 : vector<8x32xf32>
    %cst_24 = arith.constant 0.000000e+00 : f32
    %38 = vector.broadcast %cst_24 : f32 to vector<8x32xf32>
    %39 = arith.subf %38, %37 : vector<8x32xf32>
    %40 = math.exp %39 : vector<8x32xf32>
    %cst_25 = arith.constant 1.000000e+00 : f32
    %41 = vector.broadcast %cst_25 : f32 to vector<8x32xf32>
    %42 = arith.addf %41, %40 : vector<8x32xf32>
    %43 = math.log %42 : vector<8x32xf32>
    %44 = arith.addf %36, %43 : vector<8x32xf32>
    %cst_26 = arith.constant 9.99999997E-7 : f32
    %45 = vector.broadcast %cst_26 : f32 to vector<8x32xf32>
    %46 = arith.addf %44, %45 : vector<8x32xf32>
    %47 = arith.mulf %46, %2 : vector<8x32xf32>
    %48 = arith.addf %33, %47 : vector<8x32xf32>
    %cst_27 = arith.constant 0.000000e+00 : f32
    %49 = vector.broadcast %cst_27 : f32 to vector<8x1xf32>
    %50 = arith.truncf %48 : vector<8x32xf32> to vector<8x32xbf16>
    %c0_28 = arith.constant 0 : index
    %c0_29 = arith.constant 0 : index
    %c0_30 = arith.constant 0 : index
    %51 = vector.load %arg10[%c0_28, %c0_29, %c0_30] : memref<4x32x64xbf16, #tpu.memory_space<vmem>>, vector<1x32x64xbf16>
    %52 = vector.shape_cast %51 : vector<1x32x64xbf16> to vector<32x64xbf16>
    %cst_31 = arith.constant dense<0.000000e+00> : vector<8x64xf32>
    %53 = tpu.matmul %50, %52, %cst_31 {dimension_numbers = #tpu.dot_dimension_numbers<[1], [0], [0], [1], [0, 0, 1, 1], [], []>} : vector<8x32xbf16>, vector<32x64xbf16>, vector<8x64xf32> -> vector<8x64xf32>
    %c0_32 = arith.constant 0 : index
    %c0_33 = arith.constant 0 : index
    %c0_34 = arith.constant 0 : index
    %54 = vector.load %arg11[%c0_32, %c0_33, %c0_34] : memref<4x1x64xf32, #tpu.memory_space<vmem>>, vector<1x1x64xf32>
    %55 = vector.shape_cast %54 : vector<1x1x64xf32> to vector<1x64xf32>
    %56 = vector.broadcast %55 : vector<1x64xf32> to vector<8x64xf32>
    %57 = arith.addf %53, %56 : vector<8x64xf32>
    %cst_35 = arith.constant 0.000000e+00 : f32
    %58 = vector.broadcast %cst_35 : f32 to vector<8x64xf32>
    %59 = arith.maximumf %57, %58 : vector<8x64xf32>
    %60 = arith.truncf %59 : vector<8x64xf32> to vector<8x64xbf16>
    %c0_36 = arith.constant 0 : index
    %c0_37 = arith.constant 0 : index
    %c0_38 = arith.constant 0 : index
    %61 = vector.load %arg12[%c0_36, %c0_37, %c0_38] : memref<4x64x64xbf16, #tpu.memory_space<vmem>>, vector<1x64x64xbf16>
    %62 = vector.shape_cast %61 : vector<1x64x64xbf16> to vector<64x64xbf16>
    %cst_39 = arith.constant dense<0.000000e+00> : vector<8x64xf32>
    %63 = tpu.matmul %60, %62, %cst_39 {dimension_numbers = #tpu.dot_dimension_numbers<[1], [0], [0], [1], [0, 0, 1, 1], [], []>} : vector<8x64xbf16>, vector<64x64xbf16>, vector<8x64xf32> -> vector<8x64xf32>
    %c0_40 = arith.constant 0 : index
    %c0_41 = arith.constant 0 : index
    %c0_42 = arith.constant 0 : index
    %64 = vector.load %arg13[%c0_40, %c0_41, %c0_42] : memref<4x1x64xf32, #tpu.memory_space<vmem>>, vector<1x1x64xf32>
    %65 = vector.shape_cast %64 : vector<1x1x64xf32> to vector<1x64xf32>
    %66 = vector.broadcast %65 : vector<1x64xf32> to vector<8x64xf32>
    %67 = arith.addf %63, %66 : vector<8x64xf32>
    %68 = vector.extract_strided_slice %67 {offsets = [0, 0], sizes = [8, 32], strides = [1, 1]} : vector<8x64xf32> to vector<8x32xf32>
    %69 = math.tanh %68 : vector<8x32xf32>
    %70 = vector.extract_strided_slice %67 {offsets = [0, 32], sizes = [8, 32], strides = [1, 1]} : vector<8x64xf32> to vector<8x32xf32>
    %71 = math.exp %69 : vector<8x32xf32>
    %72 = arith.mulf %48, %71 : vector<8x32xf32>
    %73 = arith.addf %72, %70 : vector<8x32xf32>
    %cst_43 = arith.constant dense<0.000000e+00> : vector<8xf32>
    %74 = vector.multi_reduction <add>, %69, %cst_43 [1] : vector<8x32xf32> to vector<8xf32>
    %75 = vector.shape_cast %74 : vector<8xf32> to vector<8x1xf32>
    %76 = arith.addf %49, %75 : vector<8x1xf32>
    %77 = arith.truncf %73 : vector<8x32xf32> to vector<8x32xbf16>
    %c1 = arith.constant 1 : index
    %c0_44 = arith.constant 0 : index
    %c0_45 = arith.constant 0 : index
    %78 = vector.load %arg10[%c1, %c0_44, %c0_45] : memref<4x32x64xbf16, #tpu.memory_space<vmem>>, vector<1x32x64xbf16>
    %79 = vector.shape_cast %78 : vector<1x32x64xbf16> to vector<32x64xbf16>
    %cst_46 = arith.constant dense<0.000000e+00> : vector<8x64xf32>
    %80 = tpu.matmul %77, %79, %cst_46 {dimension_numbers = #tpu.dot_dimension_numbers<[1], [0], [0], [1], [0, 0, 1, 1], [], []>} : vector<8x32xbf16>, vector<32x64xbf16>, vector<8x64xf32> -> vector<8x64xf32>
    %c1_47 = arith.constant 1 : index
    %c0_48 = arith.constant 0 : index
    %c0_49 = arith.constant 0 : index
    %81 = vector.load %arg11[%c1_47, %c0_48, %c0_49] : memref<4x1x64xf32, #tpu.memory_space<vmem>>, vector<1x1x64xf32>
    %82 = vector.shape_cast %81 : vector<1x1x64xf32> to vector<1x64xf32>
    %83 = vector.broadcast %82 : vector<1x64xf32> to vector<8x64xf32>
    %84 = arith.addf %80, %83 : vector<8x64xf32>
    %cst_50 = arith.constant 0.000000e+00 : f32
    %85 = vector.broadcast %cst_50 : f32 to vector<8x64xf32>
    %86 = arith.maximumf %84, %85 : vector<8x64xf32>
    %87 = arith.truncf %86 : vector<8x64xf32> to vector<8x64xbf16>
    %c1_51 = arith.constant 1 : index
    %c0_52 = arith.constant 0 : index
    %c0_53 = arith.constant 0 : index
    %88 = vector.load %arg12[%c1_51, %c0_52, %c0_53] : memref<4x64x64xbf16, #tpu.memory_space<vmem>>, vector<1x64x64xbf16>
    %89 = vector.shape_cast %88 : vector<1x64x64xbf16> to vector<64x64xbf16>
    %cst_54 = arith.constant dense<0.000000e+00> : vector<8x64xf32>
    %90 = tpu.matmul %87, %89, %cst_54 {dimension_numbers = #tpu.dot_dimension_numbers<[1], [0], [0], [1], [0, 0, 1, 1], [], []>} : vector<8x64xbf16>, vector<64x64xbf16>, vector<8x64xf32> -> vector<8x64xf32>
    %c1_55 = arith.constant 1 : index
    %c0_56 = arith.constant 0 : index
    %c0_57 = arith.constant 0 : index
    %91 = vector.load %arg13[%c1_55, %c0_56, %c0_57] : memref<4x1x64xf32, #tpu.memory_space<vmem>>, vector<1x1x64xf32>
    %92 = vector.shape_cast %91 : vector<1x1x64xf32> to vector<1x64xf32>
    %93 = vector.broadcast %92 : vector<1x64xf32> to vector<8x64xf32>
    %94 = arith.addf %90, %93 : vector<8x64xf32>
    %95 = vector.extract_strided_slice %94 {offsets = [0, 0], sizes = [8, 32], strides = [1, 1]} : vector<8x64xf32> to vector<8x32xf32>
    %96 = math.tanh %95 : vector<8x32xf32>
    %97 = vector.extract_strided_slice %94 {offsets = [0, 32], sizes = [8, 32], strides = [1, 1]} : vector<8x64xf32> to vector<8x32xf32>
    %98 = math.exp %96 : vector<8x32xf32>
    %99 = arith.mulf %73, %98 : vector<8x32xf32>
    %100 = arith.addf %99, %97 : vector<8x32xf32>
    %cst_58 = arith.constant dense<0.000000e+00> : vector<8xf32>
    %101 = vector.multi_reduction <add>, %96, %cst_58 [1] : vector<8x32xf32> to vector<8xf32>
    %102 = vector.shape_cast %101 : vector<8xf32> to vector<8x1xf32>
    %103 = arith.addf %76, %102 : vector<8x1xf32>
    %104 = arith.truncf %100 : vector<8x32xf32> to vector<8x32xbf16>
    %c2 = arith.constant 2 : index
    %c0_59 = arith.constant 0 : index
    %c0_60 = arith.constant 0 : index
    %105 = vector.load %arg10[%c2, %c0_59, %c0_60] : memref<4x32x64xbf16, #tpu.memory_space<vmem>>, vector<1x32x64xbf16>
    %106 = vector.shape_cast %105 : vector<1x32x64xbf16> to vector<32x64xbf16>
    %cst_61 = arith.constant dense<0.000000e+00> : vector<8x64xf32>
    %107 = tpu.matmul %104, %106, %cst_61 {dimension_numbers = #tpu.dot_dimension_numbers<[1], [0], [0], [1], [0, 0, 1, 1], [], []>} : vector<8x32xbf16>, vector<32x64xbf16>, vector<8x64xf32> -> vector<8x64xf32>
    %c2_62 = arith.constant 2 : index
    %c0_63 = arith.constant 0 : index
    %c0_64 = arith.constant 0 : index
    %108 = vector.load %arg11[%c2_62, %c0_63, %c0_64] : memref<4x1x64xf32, #tpu.memory_space<vmem>>, vector<1x1x64xf32>
    %109 = vector.shape_cast %108 : vector<1x1x64xf32> to vector<1x64xf32>
    %110 = vector.broadcast %109 : vector<1x64xf32> to vector<8x64xf32>
    %111 = arith.addf %107, %110 : vector<8x64xf32>
    %cst_65 = arith.constant 0.000000e+00 : f32
    %112 = vector.broadcast %cst_65 : f32 to vector<8x64xf32>
    %113 = arith.maximumf %111, %112 : vector<8x64xf32>
    %114 = arith.truncf %113 : vector<8x64xf32> to vector<8x64xbf16>
    %c2_66 = arith.constant 2 : index
    %c0_67 = arith.constant 0 : index
    %c0_68 = arith.constant 0 : index
    %115 = vector.load %arg12[%c2_66, %c0_67, %c0_68] : memref<4x64x64xbf16, #tpu.memory_space<vmem>>, vector<1x64x64xbf16>
    %116 = vector.shape_cast %115 : vector<1x64x64xbf16> to vector<64x64xbf16>
    %cst_69 = arith.constant dense<0.000000e+00> : vector<8x64xf32>
    %117 = tpu.matmul %114, %116, %cst_69 {dimension_numbers = #tpu.dot_dimension_numbers<[1], [0], [0], [1], [0, 0, 1, 1], [], []>} : vector<8x64xbf16>, vector<64x64xbf16>, vector<8x64xf32> -> vector<8x64xf32>
    %c2_70 = arith.constant 2 : index
    %c0_71 = arith.constant 0 : index
    %c0_72 = arith.constant 0 : index
    %118 = vector.load %arg13[%c2_70, %c0_71, %c0_72] : memref<4x1x64xf32, #tpu.memory_space<vmem>>, vector<1x1x64xf32>
    %119 = vector.shape_cast %118 : vector<1x1x64xf32> to vector<1x64xf32>
    %120 = vector.broadcast %119 : vector<1x64xf32> to vector<8x64xf32>
    %121 = arith.addf %117, %120 : vector<8x64xf32>
    %122 = vector.extract_strided_slice %121 {offsets = [0, 0], sizes = [8, 32], strides = [1, 1]} : vector<8x64xf32> to vector<8x32xf32>
    %123 = math.tanh %122 : vector<8x32xf32>
    %124 = vector.extract_strided_slice %121 {offsets = [0, 32], sizes = [8, 32], strides = [1, 1]} : vector<8x64xf32> to vector<8x32xf32>
    %125 = math.exp %123 : vector<8x32xf32>
    %126 = arith.mulf %100, %125 : vector<8x32xf32>
    %127 = arith.addf %126, %124 : vector<8x32xf32>
    %cst_73 = arith.constant dense<0.000000e+00> : vector<8xf32>
    %128 = vector.multi_reduction <add>, %123, %cst_73 [1] : vector<8x32xf32> to vector<8xf32>
    %129 = vector.shape_cast %128 : vector<8xf32> to vector<8x1xf32>
    %130 = arith.addf %103, %129 : vector<8x1xf32>
    %131 = arith.truncf %127 : vector<8x32xf32> to vector<8x32xbf16>
    %c3 = arith.constant 3 : index
    %c0_74 = arith.constant 0 : index
    %c0_75 = arith.constant 0 : index
    %132 = vector.load %arg10[%c3, %c0_74, %c0_75] : memref<4x32x64xbf16, #tpu.memory_space<vmem>>, vector<1x32x64xbf16>
    %133 = vector.shape_cast %132 : vector<1x32x64xbf16> to vector<32x64xbf16>
    %cst_76 = arith.constant dense<0.000000e+00> : vector<8x64xf32>
    %134 = tpu.matmul %131, %133, %cst_76 {dimension_numbers = #tpu.dot_dimension_numbers<[1], [0], [0], [1], [0, 0, 1, 1], [], []>} : vector<8x32xbf16>, vector<32x64xbf16>, vector<8x64xf32> -> vector<8x64xf32>
    %c3_77 = arith.constant 3 : index
    %c0_78 = arith.constant 0 : index
    %c0_79 = arith.constant 0 : index
    %135 = vector.load %arg11[%c3_77, %c0_78, %c0_79] : memref<4x1x64xf32, #tpu.memory_space<vmem>>, vector<1x1x64xf32>
    %136 = vector.shape_cast %135 : vector<1x1x64xf32> to vector<1x64xf32>
    %137 = vector.broadcast %136 : vector<1x64xf32> to vector<8x64xf32>
    %138 = arith.addf %134, %137 : vector<8x64xf32>
    %cst_80 = arith.constant 0.000000e+00 : f32
    %139 = vector.broadcast %cst_80 : f32 to vector<8x64xf32>
    %140 = arith.maximumf %138, %139 : vector<8x64xf32>
    %141 = arith.truncf %140 : vector<8x64xf32> to vector<8x64xbf16>
    %c3_81 = arith.constant 3 : index
    %c0_82 = arith.constant 0 : index
    %c0_83 = arith.constant 0 : index
    %142 = vector.load %arg12[%c3_81, %c0_82, %c0_83] : memref<4x64x64xbf16, #tpu.memory_space<vmem>>, vector<1x64x64xbf16>
    %143 = vector.shape_cast %142 : vector<1x64x64xbf16> to vector<64x64xbf16>
    %cst_84 = arith.constant dense<0.000000e+00> : vector<8x64xf32>
    %144 = tpu.matmul %141, %143, %cst_84 {dimension_numbers = #tpu.dot_dimension_numbers<[1], [0], [0], [1], [0, 0, 1, 1], [], []>} : vector<8x64xbf16>, vector<64x64xbf16>, vector<8x64xf32> -> vector<8x64xf32>
    %c3_85 = arith.constant 3 : index
    %c0_86 = arith.constant 0 : index
    %c0_87 = arith.constant 0 : index
    %145 = vector.load %arg13[%c3_85, %c0_86, %c0_87] : memref<4x1x64xf32, #tpu.memory_space<vmem>>, vector<1x1x64xf32>
    %146 = vector.shape_cast %145 : vector<1x1x64xf32> to vector<1x64xf32>
    %147 = vector.broadcast %146 : vector<1x64xf32> to vector<8x64xf32>
    %148 = arith.addf %144, %147 : vector<8x64xf32>
    %149 = vector.extract_strided_slice %148 {offsets = [0, 0], sizes = [8, 32], strides = [1, 1]} : vector<8x64xf32> to vector<8x32xf32>
    %150 = math.tanh %149 : vector<8x32xf32>
    %151 = vector.extract_strided_slice %148 {offsets = [0, 32], sizes = [8, 32], strides = [1, 1]} : vector<8x64xf32> to vector<8x32xf32>
    %152 = math.exp %150 : vector<8x32xf32>
    %153 = arith.mulf %127, %152 : vector<8x32xf32>
    %154 = arith.addf %153, %151 : vector<8x32xf32>
    %cst_88 = arith.constant dense<0.000000e+00> : vector<8xf32>
    %155 = vector.multi_reduction <add>, %150, %cst_88 [1] : vector<8x32xf32> to vector<8xf32>
    %156 = vector.shape_cast %155 : vector<8xf32> to vector<8x1xf32>
    %157 = arith.addf %130, %156 : vector<8x1xf32>
    %158 = arith.truncf %154 : vector<8x32xf32> to vector<8x32xbf16>
    %c0_89 = arith.constant 0 : index
    %c0_90 = arith.constant 0 : index
    %159 = vector.load %arg14[%c0_89, %c0_90] : memref<32x64xbf16, #tpu.memory_space<vmem>>, vector<32x64xbf16>
    %cst_91 = arith.constant dense<0.000000e+00> : vector<8x64xf32>
    %160 = tpu.matmul %158, %159, %cst_91 {dimension_numbers = #tpu.dot_dimension_numbers<[1], [0], [0], [1], [0, 0, 1, 1], [], []>} : vector<8x32xbf16>, vector<32x64xbf16>, vector<8x64xf32> -> vector<8x64xf32>
    %c0_92 = arith.constant 0 : index
    %c0_93 = arith.constant 0 : index
    %161 = vector.load %arg15[%c0_92, %c0_93] : memref<1x64xf32, #tpu.memory_space<vmem>>, vector<1x64xf32>
    %162 = vector.broadcast %161 : vector<1x64xf32> to vector<8x64xf32>
    %163 = arith.addf %160, %162 : vector<8x64xf32>
    %cst_94 = arith.constant 0.000000e+00 : f32
    %164 = vector.broadcast %cst_94 : f32 to vector<8x64xf32>
    %165 = arith.maximumf %163, %164 : vector<8x64xf32>
    %166 = arith.truncf %165 : vector<8x64xf32> to vector<8x64xbf16>
    %c0_95 = arith.constant 0 : index
    %c0_96 = arith.constant 0 : index
    %167 = vector.load %arg16[%c0_95, %c0_96] : memref<64x64xbf16, #tpu.memory_space<vmem>>, vector<64x64xbf16>
    %cst_97 = arith.constant dense<0.000000e+00> : vector<8x64xf32>
    %168 = tpu.matmul %166, %167, %cst_97 {dimension_numbers = #tpu.dot_dimension_numbers<[1], [0], [0], [1], [0, 0, 1, 1], [], []>} : vector<8x64xbf16>, vector<64x64xbf16>, vector<8x64xf32> -> vector<8x64xf32>
    %c0_98 = arith.constant 0 : index
    %c0_99 = arith.constant 0 : index
    %169 = vector.load %arg17[%c0_98, %c0_99] : memref<1x64xf32, #tpu.memory_space<vmem>>, vector<1x64xf32>
    %170 = vector.broadcast %169 : vector<1x64xf32> to vector<8x64xf32>
    %171 = arith.addf %168, %170 : vector<8x64xf32>
    %cst_100 = arith.constant 0.000000e+00 : f32
    %172 = vector.broadcast %cst_100 : f32 to vector<8x64xf32>
    %173 = arith.maximumf %171, %172 : vector<8x64xf32>
    %174 = arith.truncf %173 : vector<8x64xf32> to vector<8x64xbf16>
    %c0_101 = arith.constant 0 : index
    %c0_102 = arith.constant 0 : index
    %175 = vector.load %arg18[%c0_101, %c0_102] : memref<64x64xbf16, #tpu.memory_space<vmem>>, vector<64x64xbf16>
    %cst_103 = arith.constant dense<0.000000e+00> : vector<8x64xf32>
    %176 = tpu.matmul %174, %175, %cst_103 {dimension_numbers = #tpu.dot_dimension_numbers<[1], [0], [0], [1], [0, 0, 1, 1], [], []>} : vector<8x64xbf16>, vector<64x64xbf16>, vector<8x64xf32> -> vector<8x64xf32>
    %c0_104 = arith.constant 0 : index
    %c0_105 = arith.constant 0 : index
    %177 = vector.load %arg19[%c0_104, %c0_105] : memref<1x64xf32, #tpu.memory_space<vmem>>, vector<1x64xf32>
    %178 = vector.broadcast %177 : vector<1x64xf32> to vector<8x64xf32>
    %179 = arith.addf %176, %178 : vector<8x64xf32>
    %cst_106 = arith.constant 0.000000e+00 : f32
    %180 = vector.broadcast %cst_106 : f32 to vector<8x64xf32>
    %181 = arith.maximumf %179, %180 : vector<8x64xf32>
    %182 = arith.truncf %181 : vector<8x64xf32> to vector<8x64xbf16>
    %c0_107 = arith.constant 0 : index
    %c0_108 = arith.constant 0 : index
    %183 = vector.load %arg20[%c0_107, %c0_108] : memref<64x32xbf16, #tpu.memory_space<vmem>>, vector<64x32xbf16>
    %cst_109 = arith.constant dense<0.000000e+00> : vector<8x32xf32>
    %184 = tpu.matmul %182, %183, %cst_109 {dimension_numbers = #tpu.dot_dimension_numbers<[1], [0], [0], [1], [0, 0, 1, 1], [], []>} : vector<8x64xbf16>, vector<64x32xbf16>, vector<8x32xf32> -> vector<8x32xf32>
    %c0_110 = arith.constant 0 : index
    %c0_111 = arith.constant 0 : index
    %185 = vector.load %arg21[%c0_110, %c0_111] : memref<1x32xf32, #tpu.memory_space<vmem>>, vector<1x32xf32>
    %186 = vector.broadcast %185 : vector<1x32xf32> to vector<8x32xf32>
    %187 = arith.addf %184, %186 : vector<8x32xf32>
    %c0_112 = arith.constant 0 : index
    %c0_113 = arith.constant 0 : index
    %188 = vector.load %arg22[%c0_112, %c0_113] : memref<8x128xf32, #tpu.memory_space<vmem>>, vector<8x32xf32>
    tpu.vector_store %arg22[%c0_112, %c0_113], %187 {strides = array<i32>} : memref<8x128xf32, #tpu.memory_space<vmem>>, vector<8x32xf32>,
    %c0_114 = arith.constant 0 : index
    %c32 = arith.constant 32 : index
    %189 = vector.load %arg22[%c0_114, %c32] : memref<8x128xf32, #tpu.memory_space<vmem>>, vector<8x32xf32>
    tpu.vector_store %arg22[%c0_114, %c32], %33 {strides = array<i32>} : memref<8x128xf32, #tpu.memory_space<vmem>>, vector<8x32xf32>,
    %c0_115 = arith.constant 0 : index
    %c64 = arith.constant 64 : index
    %190 = vector.load %arg22[%c0_115, %c64] : memref<8x128xf32, #tpu.memory_space<vmem>>, vector<8x32xf32>
    tpu.vector_store %arg22[%c0_115, %c64], %46 {strides = array<i32>} : memref<8x128xf32, #tpu.memory_space<vmem>>, vector<8x32xf32>,
    %c0_116 = arith.constant 0 : index
    %c96 = arith.constant 96 : index
    %191 = vector.load %arg22[%c0_116, %c96] : memref<8x128xf32, #tpu.memory_space<vmem>>, vector<8x1xf32>
    tpu.vector_store %arg22[%c0_116, %c96], %157 {strides = array<i32>} : memref<8x128xf32, #tpu.memory_space<vmem>>, vector<8x1xf32>,
    return
  }
  func.func @transform_0(%arg0: i32) -> (i32, i32) {
    %c0_i32 = arith.constant 0 : i32
    %c0_i32_0 = arith.constant 0 : i32
    return %arg0, %c0_i32 : i32, i32
  }
  func.func @transform_1(%arg0: i32) -> (i32, i32) {
    %c0_i32 = arith.constant 0 : i32
    %c0_i32_0 = arith.constant 0 : i32
    %c0_i32_1 = arith.constant 0 : i32
    return %c0_i32, %c0_i32_0 : i32, i32
  }
  func.func @transform_2(%arg0: i32) -> (i32, i32) {
    %c0_i32 = arith.constant 0 : i32
    %c0_i32_0 = arith.constant 0 : i32
    %c0_i32_1 = arith.constant 0 : i32
    return %c0_i32, %c0_i32_0 : i32, i32
  }
  func.func @transform_3(%arg0: i32) -> (i32, i32) {
    %c0_i32 = arith.constant 0 : i32
    %c0_i32_0 = arith.constant 0 : i32
    %c0_i32_1 = arith.constant 0 : i32
    return %c0_i32, %c0_i32_0 : i32, i32
  }
  func.func @transform_4(%arg0: i32) -> (i32, i32) {
    %c0_i32 = arith.constant 0 : i32
    %c0_i32_0 = arith.constant 0 : i32
    %c0_i32_1 = arith.constant 0 : i32
    return %c0_i32, %c0_i32_0 : i32, i32
  }
  func.func @transform_5(%arg0: i32) -> (i32, i32) {
    %c0_i32 = arith.constant 0 : i32
    %c0_i32_0 = arith.constant 0 : i32
    %c0_i32_1 = arith.constant 0 : i32
    return %c0_i32, %c0_i32_0 : i32, i32
  }
  func.func @transform_6(%arg0: i32) -> (i32, i32) {
    %c0_i32 = arith.constant 0 : i32
    %c0_i32_0 = arith.constant 0 : i32
    %c0_i32_1 = arith.constant 0 : i32
    return %c0_i32, %c0_i32_0 : i32, i32
  }
  func.func @transform_7(%arg0: i32) -> (i32, i32) {
    %c0_i32 = arith.constant 0 : i32
    %c0_i32_0 = arith.constant 0 : i32
    %c0_i32_1 = arith.constant 0 : i32
    return %c0_i32, %c0_i32_0 : i32, i32
  }
  func.func @transform_8(%arg0: i32) -> (i32, i32) {
    %c0_i32 = arith.constant 0 : i32
    %c0_i32_0 = arith.constant 0 : i32
    %c0_i32_1 = arith.constant 0 : i32
    return %c0_i32, %c0_i32_0 : i32, i32
  }
  func.func @transform_9(%arg0: i32) -> (i32, i32, i32) {
    %c0_i32 = arith.constant 0 : i32
    %c0_i32_0 = arith.constant 0 : i32
    %c0_i32_1 = arith.constant 0 : i32
    %c0_i32_2 = arith.constant 0 : i32
    return %c0_i32, %c0_i32_0, %c0_i32_1 : i32, i32, i32
  }
  func.func @transform_10(%arg0: i32) -> (i32, i32, i32) {
    %c0_i32 = arith.constant 0 : i32
    %c0_i32_0 = arith.constant 0 : i32
    %c0_i32_1 = arith.constant 0 : i32
    %c0_i32_2 = arith.constant 0 : i32
    return %c0_i32, %c0_i32_0, %c0_i32_1 : i32, i32, i32
  }
  func.func @transform_11(%arg0: i32) -> (i32, i32, i32) {
    %c0_i32 = arith.constant 0 : i32
    %c0_i32_0 = arith.constant 0 : i32
    %c0_i32_1 = arith.constant 0 : i32
    %c0_i32_2 = arith.constant 0 : i32
    return %c0_i32, %c0_i32_0, %c0_i32_1 : i32, i32, i32
  }
  func.func @transform_12(%arg0: i32) -> (i32, i32, i32) {
    %c0_i32 = arith.constant 0 : i32
    %c0_i32_0 = arith.constant 0 : i32
    %c0_i32_1 = arith.constant 0 : i32
    %c0_i32_2 = arith.constant 0 : i32
    return %c0_i32, %c0_i32_0, %c0_i32_1 : i32, i32, i32
  }
  func.func @transform_13(%arg0: i32) -> (i32, i32) {
    %c0_i32 = arith.constant 0 : i32
    %c0_i32_0 = arith.constant 0 : i32
    %c0_i32_1 = arith.constant 0 : i32
    return %c0_i32, %c0_i32_0 : i32, i32
  }
  func.func @transform_14(%arg0: i32) -> (i32, i32) {
    %c0_i32 = arith.constant 0 : i32
    %c0_i32_0 = arith.constant 0 : i32
    %c0_i32_1 = arith.constant 0 : i32
    return %c0_i32, %c0_i32_0 : i32, i32
  }
  func.func @transform_15(%arg0: i32) -> (i32, i32) {
    %c0_i32 = arith.constant 0 : i32
    %c0_i32_0 = arith.constant 0 : i32
    %c0_i32_1 = arith.constant 0 : i32
    return %c0_i32, %c0_i32_0 : i32, i32
  }
  func.func @transform_16(%arg0: i32) -> (i32, i32) {
    %c0_i32 = arith.constant 0 : i32
    %c0_i32_0 = arith.constant 0 : i32
    %c0_i32_1 = arith.constant 0 : i32
    return %c0_i32, %c0_i32_0 : i32, i32
  }
  func.func @transform_17(%arg0: i32) -> (i32, i32) {
    %c0_i32 = arith.constant 0 : i32
    %c0_i32_0 = arith.constant 0 : i32
    %c0_i32_1 = arith.constant 0 : i32
    return %c0_i32, %c0_i32_0 : i32, i32
  }
  func.func @transform_18(%arg0: i32) -> (i32, i32) {
    %c0_i32 = arith.constant 0 : i32
    %c0_i32_0 = arith.constant 0 : i32
    %c0_i32_1 = arith.constant 0 : i32
    return %c0_i32, %c0_i32_0 : i32, i32
  }
  func.func @transform_19(%arg0: i32) -> (i32, i32) {
    %c0_i32 = arith.constant 0 : i32
    %c0_i32_0 = arith.constant 0 : i32
    %c0_i32_1 = arith.constant 0 : i32
    return %c0_i32, %c0_i32_0 : i32, i32
  }
  func.func @transform_20(%arg0: i32) -> (i32, i32) {
    %c0_i32 = arith.constant 0 : i32
    %c0_i32_0 = arith.constant 0 : i32
    %c0_i32_1 = arith.constant 0 : i32
    return %c0_i32, %c0_i32_0 : i32, i32
  }
  func.func @transform_21(%arg0: i32) -> (i32, i32) {
    %c0_i32 = arith.constant 0 : i32
    %c0_i32_0 = arith.constant 0 : i32
    return %arg0, %c0_i32 : i32, i32
  }
}

</mosaic_0001>

<bundles_post_ra>
// kernel: tpu_custom_call.1
= control target key start
LH: loop header
LB: loop body
LE: loop exit
PB: predicated region body
PF: predicated region fallthrough
CT: control target
= control target key end

     0   :  { %s2247_s0 = inlined_call_operand.hbm [shape: f32[8,64], index: 0, kind: input, shape index: {}]   ;;  %s2248_s1 = inlined_call_operand.hbm [shape: bf16[32,64], index: 1, kind: input, shape index: {}]   ;;  %s2249_s2 = inlined_call_operand.hbm [shape: f32[1,64], index: 2, kind: input, shape index: {}]   ;;  %s2250_s3 = inlined_call_operand.vmem [shape: bf16[64,64], index: 3, kind: input, shape index: {}]   ;;  %s2251_s4 = inlined_call_operand.hbm [shape: f32[1,64], index: 4, kind: input, shape index: {}]   ;;  %s2252_s5 = inlined_call_operand.hbm [shape: bf16[64,64], index: 5, kind: input, shape index: {}]   ;;  %s2253_s6 = inlined_call_operand.hbm [shape: f32[1,64], index: 6, kind: input, shape index: {}]   ;;  %s2254_s7 = inlined_call_operand.hbm [shape: bf16[64,64], index: 7, kind: input, shape index: {}]   ;;  %s2255_s8 = inlined_call_operand.hbm [shape: f32[1,64], index: 8, kind: input, shape index: {}]   ;;  %s2256_s9 = inlined_call_operand.hbm [shape: bf16[4,32,64], index: 9, kind: input, shape index: {}]   ;;  %s2257_s10 = inlined_call_operand.hbm [shape: f32[4,1,64], index: 10, kind: input, shape index: {}]   ;;  %s2258_s11 = inlined_call_operand.hbm [shape: bf16[4,64,64], index: 11, kind: input, shape index: {}]   ;;  %s2259_s12 = inlined_call_operand.hbm [shape: f32[4,1,64], index: 12, kind: input, shape index: {}]   ;;  %s2260_s13 = inlined_call_operand.hbm [shape: bf16[32,64], index: 13, kind: input, shape index: {}]   ;;  %s2261_s14 = inlined_call_operand.hbm [shape: f32[1,64], index: 14, kind: input, shape index: {}]   ;;  %s2262_s15 = inlined_call_operand.hbm [shape: bf16[64,64], index: 15, kind: input, shape index: {}]   ;;  %s2263_s16 = inlined_call_operand.hbm [shape: f32[1,64], index: 16, kind: input, shape index: {}]   ;;  %s2264_s17 = inlined_call_operand.vmem [shape: bf16[64,64], index: 17, kind: input, shape index: {}]   ;;  %s2265_s18 = inlined_call_operand.vmem [shape: f32[1,64], index: 18, kind: input, shape index: {}]   ;;  %s2266_s19 = inlined_call_operand.vmem [shape: bf16[64,32], index: 19, kind: input, shape index: {}]   ;;  %s2267_s20 = inlined_call_operand.vmem [shape: f32[1,32], index: 20, kind: input, shape index: {}]   ;;  %s2268_s21 = inlined_call_operand.hbm [shape: f32[8,128], index: 21, kind: output, shape index: {}]  }
   0x1   :  { %2274 = sst [smem:[#allocation39_spill]] %s2247_s0 }
   0x2   :  { %2275 = sst [smem:[#allocation40_spill]] %s2248_s1 }
   0x3   :  { %2276 = sst [smem:[#allocation41_spill]] %s2249_s2 }
   0x4   :  { %2277 = sst [smem:[#allocation42_spill]] %s2250_s3 }
   0x5   :  { %2278 = sst [smem:[#allocation43_spill]] %s2251_s4 }
   0x6   :  { %2279 = sst [smem:[#allocation44_spill]] %s2252_s5 }
   0x7   :  { %26 = vsyncpa [#allocation3], 0 }
   0x8   :  { %27 = vsyncpa [#allocation6], 0 }
   0x9   :  { %28 = vsyncpa [#allocation9], 0 }
   0xa   :  { %29 = vsyncpa [#allocation12], 0 }
   0xb   :  { %30 = vsyncpa [#allocation15], 0 }
   0xc   :  { %31 = vsyncpa [#allocation18], 0 }
   0xd   :  { %32 = vsyncpa [#allocation21], 0 }
   0xe   :  { %33 = vsyncpa [#allocation24], 0 }
   0xf   :  { %34 = vsyncpa [#allocation27], 0  ;;  %s2280_s26 = sld [smem:[#allocation40_spill]] }
  0x15   :  { %s51_s27 = sshll.u32 %s2280_s26, 4  ;;  %s52_s27 = int_to_ptr.hbm [resolvable:$true] %s51_s27 }
  0x16   :  { %35 = vsyncpa [#allocation4], 0  ;;  %s1953_s3 = smov [#allocation5]   ;;  %s2281_s4 = sld [smem:[#allocation43_spill]] }
  0x17   :  { %s53_s28 = sshll.u32 %s1953_s3, 4  ;;  %s2270_s5 = smov 64   ;;  %s54_s28 = int_to_ptr.vmem [resolvable:$true] %s53_s28 }
  0x18   :  { %s2272_s22 = smov 4   ;;  %s1956_s23 = smov [#allocation8]  }
  0x19   :  { %59 = dma.hbm_to_vmem [thread:$0]  %s52_s27, 256, %s54_s28, [#allocation6], %s2270_s5, %s2270_s5, %s2272_s22  }
  0x1a   :  { %s80_s1 = sshll.u32 %s1956_s23, 4  ;;  %s102_s25 = sshll.u32 %s2253_s6, 4  ;;  %s81_s1 = int_to_ptr.vmem [resolvable:$true] %s80_s1  ;;  %s103_s25 = int_to_ptr.hbm [resolvable:$true] %s102_s25 }
  0x1b   :  { %s126_s29 = sshll.u32 %s2255_s8, 4  ;;  %s1957_s0 = smov [#allocation11]   ;;  %s127_s29 = int_to_ptr.hbm [resolvable:$true] %s126_s29 }
  0x1c   :  { %s78_s30 = sshll.u32 %s2281_s4, 4  ;;  %s104_s4 = sshll.u32 %s1957_s0, 4  ;;  %s79_s30 = int_to_ptr.hbm [resolvable:$true] %s78_s30  ;;  %s105_s4 = int_to_ptr.vmem [resolvable:$true] %s104_s4 }
  0x1d   :  { %83 = dma.hbm_to_vmem [thread:$0]  %s79_s30, 16, %s81_s1, [#allocation9]  }
  0x1e   :  { %107 = dma.hbm_to_vmem [thread:$0]  %s103_s25, 16, %s105_s4, [#allocation12]  }
  0x1f   :  { %s1958_s27 = smov [#allocation14]   ;;  %s149_s22 = sshll.u32 %s2257_s10, 4  ;;  %s150_s22 = int_to_ptr.hbm [resolvable:$true] %s149_s22 }
  0x20   :  { %s128_s28 = sshll.u32 %s1958_s27, 4  ;;  %s1959_s6 = smov [#allocation17]   ;;  %s129_s28 = int_to_ptr.vmem [resolvable:$true] %s128_s28 }
  0x21   :  { %131 = dma.hbm_to_vmem [thread:$0]  %s127_s29, 16, %s129_s28, [#allocation15]  }
  0x22   :  { %s151_s30 = sshll.u32 %s1959_s6, 4  ;;  %s175_s8 = sshll.u32 %s2259_s12, 4  ;;  %s152_s30 = int_to_ptr.vmem [resolvable:$true] %s151_s30  ;;  %s176_s8 = int_to_ptr.hbm [resolvable:$true] %s175_s8 }
  0x23   :  { %s1960_s2 = smov 16   ;;  %s1961_s26 = smov 1  }
  0x24   :  { %157 = dma.hbm_to_vmem [thread:$0]  %s150_s22, 64, %s152_s30, [#allocation18], %s1960_s2, %s1960_s2, %s1961_s26  }
  0x25   :  { %s1962_s25 = smov [#allocation20]   ;;  %s202_s10 = sshll.u32 %s2261_s14, 4  ;;  %s203_s10 = int_to_ptr.hbm [resolvable:$true] %s202_s10 }
  0x26   :  { %s177_s3 = sshll.u32 %s1962_s25, 4  ;;  %s2282_s27 = sld [smem:[#allocation39_spill]]  ;;  %s178_s3 = int_to_ptr.vmem [resolvable:$true] %s177_s3 }
  0x27   :  { %183 = dma.hbm_to_vmem [thread:$0]  %s176_s8, 64, %s178_s3, [#allocation21], %s1960_s2, %s1960_s2, %s1961_s26  }
  0x28   :  { %s1963_s23 = smov [#allocation23]   ;;  %s1964_s12 = smov [#allocation2]  }
  0x29   :  { %s204_s6 = sshll.u32 %s1963_s23, 4  ;;  %s43_s22 = sshll.u32 %s1964_s12, 4  ;;  %s205_s6 = int_to_ptr.vmem [resolvable:$true] %s204_s6  ;;  %s44_s22 = int_to_ptr.vmem [resolvable:$true] %s43_s22 }
  0x2a   :  { %207 = dma.hbm_to_vmem [thread:$0]  %s203_s10, 16, %s205_s6, [#allocation24]  }
  0x2b   :  { %s2283_s24 = sld [smem:[#allocation41_spill]]  ;;  %s1965_s3 = smov [#allocation7]  }
  0x2c   :  { %s41_s28 = sshll.u32 %s2282_s27, 4  ;;  %s2284_s2 = sld [smem:[#allocation44_spill]]  ;;  %s42_s28 = int_to_ptr.hbm [resolvable:$true] %s41_s28 }
  0x2d   :  { %46 = dma.hbm_to_vmem [thread:$0]  %s42_s28, 128, %s44_s22, [#allocation3]  }
  0x2e   :  { %s67_s0 = sshll.u32 %s1965_s3, 4  ;;  %s1966_s4 = smov [#allocation10]   ;;  %s68_s0 = int_to_ptr.vmem [resolvable:$true] %s67_s0 }
  0x2f   :  { %s90_s10 = sshll.u32 %s1966_s4, 4  ;;  %s112_s27 = sshll.u32 %s2254_s7, 4  ;;  %s91_s10 = int_to_ptr.vmem [resolvable:$true] %s90_s10  ;;  %s113_s27 = int_to_ptr.hbm [resolvable:$true] %s112_s27 }
  0x30   :  { %s2285_s23 = smov 4   ;;  %s2286_s6 = smov 64  }
  0x31   :  { %s65_s25 = sshll.u32 %s2283_s24, 4  ;;  %s136_s22 = sshll.u32 %s2256_s9, 4  ;;  %s66_s25 = int_to_ptr.hbm [resolvable:$true] %s65_s25  ;;  %s137_s22 = int_to_ptr.hbm [resolvable:$true] %s136_s22 }
  0x32   :  { %s88_s26 = sshll.u32 %s2284_s2, 4  ;;  %s1967_s30 = smov [#allocation13]   ;;  %s89_s26 = int_to_ptr.hbm [resolvable:$true] %s88_s26 }
  0x33   :  { %70 = dma.hbm_to_vmem [thread:$0]  %s66_s25, 16, %s68_s0, [#allocation6]  }
  0x34   :  { %96 = dma.hbm_to_vmem [thread:$0]  %s89_s26, 512, %s91_s10, [#allocation9], %s2286_s6, %s2286_s6, %s2285_s23  }
  0x35   :  { %s114_s1 = sshll.u32 %s1967_s30, 4  ;;  %s1968_s24 = smov [#allocation16]   ;;  %s115_s1 = int_to_ptr.vmem [resolvable:$true] %s114_s1 }
  0x36   :  { %120 = dma.hbm_to_vmem [thread:$0]  %s113_s27, 512, %s115_s1, [#allocation12], %s2286_s6, %s2286_s6, %s2285_s23  }
  0x37   :  { %s138_s7 = sshll.u32 %s1968_s24, 4  ;;  %s162_s8 = sshll.u32 %s2258_s11, 4  ;;  %s139_s7 = int_to_ptr.vmem [resolvable:$true] %s138_s7  ;;  %s163_s8 = int_to_ptr.hbm [resolvable:$true] %s162_s8 }
  0x38   :  { %144 = dma.hbm_to_vmem [thread:$0]  %s137_s22, 1024, %s139_s7, [#allocation15], %s2286_s6, %s2286_s6, %s2285_s23  }
  0x39   :  { %s188_s26 = sshll.u32 %s2260_s13, 4  ;;  %s1969_s3 = smov [#allocation19]   ;;  %s189_s26 = int_to_ptr.hbm [resolvable:$true] %s188_s26 }
  0x3a   :  { %s164_s0 = sshll.u32 %s1969_s3, 4  ;;  %s1970_s4 = smov [#allocation22]   ;;  %s165_s0 = int_to_ptr.vmem [resolvable:$true] %s164_s0 }
  0x3b   :  { %170 = dma.hbm_to_vmem [thread:$0]  %s163_s8, 2048, %s165_s0, [#allocation18], %s2286_s6, %s2286_s6, %s2285_s23  }
  0x3c   :  { %s190_s11 = sshll.u32 %s1970_s4, 4  ;;  %s212_s29 = sshll.u32 %s2262_s15, 4  ;;  %s191_s11 = int_to_ptr.vmem [resolvable:$true] %s190_s11  ;;  %s213_s29 = int_to_ptr.hbm [resolvable:$true] %s212_s29 }
  0x3d   :  { %196 = dma.hbm_to_vmem [thread:$0]  %s189_s26, 256, %s191_s11, [#allocation21], %s2286_s6, %s2286_s6, %s2285_s23  }
  0x3e   :  { %s226_s28 = sshll.u32 %s2263_s16, 4  ;;  %s1971_s12 = smov [#allocation25]   ;;  %s227_s28 = int_to_ptr.hbm [resolvable:$true] %s226_s28 }
  0x3f   :  { %s214_s22 = sshll.u32 %s1971_s12, 4  ;;  %s1972_s30 = smov [#allocation26]   ;;  %s215_s22 = int_to_ptr.vmem [resolvable:$true] %s214_s22 }
  0x40   :  { %220 = dma.hbm_to_vmem [thread:$0]  %s213_s29, 512, %s215_s22, [#allocation24], %s2286_s6, %s2286_s6, %s2285_s23  }
  0x41   :  { %s228_s15 = sshll.u32 %s1972_s30, 4  ;;  %s229_s15 = int_to_ptr.vmem [resolvable:$true] %s228_s15 }
  0x42   :  { %231 = dma.hbm_to_vmem [thread:$0]  %s227_s28, 16, %s229_s15, [#allocation27]  }
  0x43   :  { %1933 = dma.done.wait [#allocation3], 128  }
  0x44   :  { %1934 = vsyncadd [#allocation3], 4294967168 }
  0x45   :  { %1935 = dma.done.wait [#allocation6], 272  }
  0x46   :  { %1936 = vsyncadd [#allocation6], 4294967024 }
  0x47   :  { %1937 = dma.done.wait [#allocation9], 528  }
  0x48   :  { %1938 = vsyncadd [#allocation9], 4294966768 }
  0x49   :  { %1939 = dma.done.wait [#allocation12], 528  }
  0x4a   :  { %1940 = vsyncadd [#allocation12], 4294966768 }
  0x4b   :  { %1941 = dma.done.wait [#allocation15], 1040  }
  0x4c   :  { %1942 = vsyncadd [#allocation15], 4294966256 }
  0x4d   :  { %1943 = dma.done.wait [#allocation18], 2112  }
  0x4e   :  { %1944 = vsyncadd [#allocation18], 4294965184 }
  0x4f   :  { %1945 = dma.done.wait [#allocation21], 320  }
  0x50   :  { %1946 = vsyncadd [#allocation21], 4294966976 }
  0x51   :  { %1947 = dma.done.wait [#allocation24], 528  }
  0x52   :  { %1948 = vsyncadd [#allocation24], 4294966768 }
  0x53   :  { %1949 = dma.done.wait [#allocation27], 16  }
  0x54   :  { %1950 = vsyncadd [#allocation27], 4294967280  ;;  %v1415_v0 = vld [vmem:[#allocation5 + $0x8] sm:$0xff]  ;;  %v1414_v1 = vld [vmem:[#allocation5] sm:$0xff]  ;;  %s2287_s6 = sld [smem:[#allocation42_spill]]  ;;  %vm327_vm0 = vcmask 261120  }
  0x55   :  { %v2155_v2 = vld [vmem:[#allocation2] sm:$0xff]  ;;  %337 = vmatpush.bf16.msra.mxu0 %v1415_v0  ;;  %v1423_v8 = vld [vmem:[#allocation10 + $0x18] sm:$0xff]  ;;  %v1422_v9 = vld [vmem:[#allocation10 + $0x10] sm:$0xff]  ;;  %vm382_vm1 = vcmask 523264   ;;  %s1973_s9 = smov 96   ;;  %s1974_s2 = smov 32  }
  0x56   :  { %v306_v5 = vpack.c.bf16 %v2155_v2, %v2155_v2  ;;  %444 = vmatpush.bf16.msra.mxu2 %v1423_v8  ;;  %v1489_v10 = vld [vmem:[#allocation7] ss:$0 sm:$0xff]  ;;  %v1421_v16 = vld [vmem:[#allocation10 + $0x8] sm:$0xff]  ;;  %v1420_v17 = vld [vmem:[#allocation10] sm:$0xff]  ;;  %vm1155_vm2 = vcmask 523520   ;;  %s1172_s25 = sshll.u32 %s2268_s21, 4  ;;  %s1173_s25 = int_to_ptr.hbm [resolvable:$true] %s1172_s25 }
  0x57   :  { %v1427_v18 = vld [vmem:[#allocation13 + $0x18] sm:$0xff]  ;;  %v1426_v19 = vld [vmem:[#allocation13 + $0x10] sm:$0xff]  ;;  %v1425_v26 = vld [vmem:[#allocation13 + $0x8] sm:$0xff]  ;;  %vm1161_vm3 = vcmask 785920   ;;  %vm1163_vm4 = vcmask 794368  }
  0x58   :  { %498 = vmatpush.bf16.msra.mxu3 %v1427_v18  ;;  %v1490_v20 = vld [vmem:[#allocation8] ss:$0 sm:$0xff]  ;;  %v1424_v27 = vld [vmem:[#allocation13] sm:$0xff]  ;;  %v1491_v28 = vld [vmem:[#allocation11] ss:$0 sm:$0xff] }
  0x59   :  { %338 = vmatpush.bf16.msra.mxu0 %v1414_v1  ;;  %v1492_v34 = vld [vmem:[#allocation14] ss:$0 sm:$0xff]  ;;  %v1429_v37 = vld [vmem:[#allocation16 + $0x8] sm:$0xff]  ;;  %v1428_v39 = vld [vmem:[#allocation16] sm:$0xff] }
  0x5a   :  { %v1419_v3 = vld [vmem:[%s2287_s6 + $0x18] sm:$0xff]  ;;  %v1418_v4 = vld [vmem:[%s2287_s6 + $0x10] sm:$0xff]  ;;  %v1417_v6 = vld [vmem:[%s2287_s6 + $0x8] sm:$0xff]  ;;  %445 = vmatpush.bf16.msra.mxu2 %v1422_v9 }
  0x5b   :  { %390 = vmatpush.bf16.msra.mxu1 %v1419_v3  ;;  %v1416_v7 = vld [vmem:[%s2287_s6] sm:$0xff]  ;;  %v1432_v52 = vld [vmem:[#allocation19 + $0x10] sm:$0xff]  ;;  %v1431_v53 = vld [vmem:[#allocation19 + $0x8] sm:$0xff] }
  0x5c   :  { %1198 = vmatmul.msk.bf16.vlgmr.msra.gmra.mxu0 %vm327_vm0, %v306_v5  ;;  %499 = vmatpush.bf16.msra.mxu3 %v1426_v19  ;;  %v1433_v51 = vld [vmem:[#allocation19 + $0x18] sm:$0xff]  ;;  %v1430_v57 = vld [vmem:[#allocation19] sm:$0xff]  ;;  %v1434_v1 = vld [vmem:[#allocation16 + $0x10] sm:$0xff] }
  0x5d   :  { %553 = vmatpush.bf16.msrb.mxu0 %v1429_v37  ;;  %v1493_v58 = vld [vmem:[#allocation17] ss:$0 sm:$0xff]  ;;  %v1435_v0 = vld [vmem:[#allocation16 + $0x18] sm:$0xff]  ;;  %v1437_v8 = vld [vmem:[#allocation19 + $0x28] sm:$0xff] }
  0x5e   :  { %446 = vmatpush.bf16.msra.mxu2 %v1421_v16  ;;  %v1436_v16 = vld [vmem:[#allocation19 + $0x20] sm:$0xff] }
  0x5f   :  { %391 = vmatpush.bf16.msra.mxu1 %v1418_v4 }
  0x60   :  { %500 = vmatpush.bf16.msra.mxu3 %v1425_v26 }
  0x61   :  { %554 = vmatpush.bf16.msrb.mxu0 %v1428_v39  ;;  %v1443_v39 = vld [vmem:[#allocation19 + $0x48] sm:$0xff] }
  0x62   :  { %447 = vmatpush.bf16.msra.mxu2 %v1420_v17  ;;  %v1495_v17 = vld [vmem:[#allocation17 + $0x1] ss:$0 sm:$0xff] }
  0x63   :  { %392 = vmatpush.bf16.msra.mxu1 %v1417_v6  ;;  %v1439_v6 = vld [vmem:[#allocation19 + $0x38] sm:$0xff] }
  0x64   :  { %501 = vmatpush.bf16.msra.mxu3 %v1424_v27  ;;  %v1440_v27 = vld [vmem:[#allocation16 + $0x20] sm:$0xff] }
  0x66   :  { %659 = vmatpush.bf16.msrb.mxu2 %v1435_v0  ;;  %v1449_v0 = vld [vmem:[#allocation19 + $0x68] sm:$0xff] }
  0x67   :  { %393 = vmatpush.bf16.msra.mxu1 %v1416_v7  ;;  %v1438_v7 = vld [vmem:[#allocation19 + $0x30] sm:$0xff] }
  0x68   :  { %713 = vmatpush.bf16.msrb.mxu3 %v1439_v6 }
  0x6a   :  { %660 = vmatpush.bf16.msrb.mxu2 %v1434_v1  ;;  %v1448_v1 = vld [vmem:[#allocation19 + $0x60] sm:$0xff] }
  0x6b   :  { %605 = vmatpush.bf16.msrb.mxu1 %v1433_v51 }
  0x6c   :  { %714 = vmatpush.bf16.msrb.mxu3 %v1438_v7 }
  0x6f   :  { %606 = vmatpush.bf16.msrb.mxu1 %v1432_v52  ;;  %v1447_v52 = vld [vmem:[#allocation16 + $0x38] sm:$0xff] }
  0x70   :  { %715 = vmatpush.bf16.msrb.mxu3 %v1437_v8  ;;  %v1500_v8 = vld [vmem:[#allocation20 + $0x3] ss:$0 sm:$0xff] }
  0x73   :  { %607 = vmatpush.bf16.msrb.mxu1 %v1431_v53  ;;  %v1446_v53 = vld [vmem:[#allocation16 + $0x30] sm:$0xff] }
  0x74   :  { %716 = vmatpush.bf16.msrb.mxu3 %v1436_v16 }
  0x77   :  { %608 = vmatpush.bf16.msrb.mxu1 %v1430_v57 }
  0xd9   :  { %v340_v11 = vpop.f32.mrf.mxu0 }
  0xda   :  { %v341_v12 = vadd.f32 %v1489_v10, %v340_v11 }
  0xdc   :  { %v344_v13 = vmax.f32 %v341_v12, 0.0 }
  0xde   :  { %v345_v14 = vpack.c.bf16 %v344_v13, %v344_v13 }
  0xe0   :  { %1215 = vmatmul.msk.bf16.vlgmr.msra.gmra.mxu1 %vm382_vm1, %v345_v14 }
  0xe1   :  { %v342_v15 = vpop.f32.mrf.mxu0 }
 0x15d   :  { %v395_v21 = vpop.f32.mrf.mxu1 }
 0x15e   :  { %v396_v22 = vadd.f32 %v1490_v20, %v395_v21 }
 0x160   :  { %v399_v23 = vmax.f32 %v396_v22, 0.0 }
 0x162   :  { %v400_v24 = vpack.c.bf16 %v399_v23, %v399_v23  ;;  %v1496_v23 = vld [vmem:[#allocation20 + $0x1] ss:$0 sm:$0xff] }
 0x164   :  { %1232 = vmatmul.msk.bf16.vlgmr.msra.gmra.mxu2 %vm382_vm1, %v400_v24  ;;  %v1441_v24 = vld [vmem:[#allocation16 + $0x28] sm:$0xff] }
 0x165   :  { %v397_v25 = vpop.f32.mrf.mxu1  ;;  %767 = vmatpush.bf16.msra.mxu0 %v1441_v24  ;;  %875 = vmatpush.bf16.msra.mxu2 %v1447_v52  ;;  %v1456_v24 = vld [vmem:[#allocation25 + $0x10] sm:$0xff] }
 0x169   :  { %768 = vmatpush.bf16.msra.mxu0 %v1440_v27  ;;  %876 = vmatpush.bf16.msra.mxu2 %v1446_v53  ;;  %v1460_v27 = vld [vmem:[%s2264_s17 + $0x10] sm:$0xff] }
 0x1e7   :  { %v449_v29 = vpop.f32.mrf.mxu2 }
 0x1e8   :  { %v450_v30 = vadd.f32 %v1491_v28, %v449_v29 }
 0x1ea   :  { %v453_v31 = vmax.f32 %v450_v30, 0.0 }
 0x1ec   :  { %v454_v32 = vpack.c.bf16 %v453_v31, %v453_v31 }
 0x1ee   :  { %1249 = vmatmul.msk.bf16.vlgmr.msra.gmra.mxu3 %vm382_vm1, %v454_v32 }
 0x1ef   :  { %v451_v33 = vpop.f32.mrf.mxu2 }
 0x1f0   :  { %v1445_v33 = vld [vmem:[#allocation19 + $0x58] sm:$0xff] }
 0x1f1   :  { %821 = vmatpush.bf16.msra.mxu1 %v1445_v33 }
 0x271   :  { %v503_v35 = vpop.f32.mrf.mxu3 }
 0x272   :  { %v2175_v36 = vadd.f32 %v1492_v34, %v503_v35  ;;  %v1444_v34 = vld [vmem:[#allocation19 + $0x50] sm:$0xff] }
 0x273   :  { %822 = vmatpush.bf16.msra.mxu1 %v1444_v34 }
 0x274   :  { %v508_v38 = vand.u32 2147483647, %v2175_v36  ;;  %v507_v46 = vmax.f32 %v2175_v36, 0.0 }
 0x276   :  { %v509_v40 = vsub.f32 0.0, %v508_v38 }
 0x277   :  { %823 = vmatpush.bf16.msra.mxu1 %v1443_v39  ;;  %v1463_v39 = vld [vmem:[%s2266_s19 + $0x8] sm:$0xff] }
 0x278   :  { %v510_v41 = vmul.f32 1.442695, %v509_v40 }
 0x279   :  { %v505_v42 = vpop.f32.mrf.mxu3 }
 0x27a   :  { %1505 = vpow2.f32 %v510_v41  ;;  %v1442_v41 = vld [vmem:[#allocation19 + $0x40] sm:$0xff]  ;;  %v1497_v42 = vld [vmem:[#allocation17 + $0x2] ss:$0 sm:$0xff] }
 0x27b   :  { %824 = vmatpush.bf16.msra.mxu1 %v1442_v41 }
 0x280   :  { %v1506_v43 = vpop.eup %1505 }
 0x281   :  { %v512_v44 = vadd.f32 1.0, %v1506_v43 }
 0x283   :  { %1507 = vlog2.f32 %v512_v44 }
 0x289   :  { %v1508_v45 = vpop.eup %1507 }
 0x28a   :  { %v514_v47 = vmul.f32 0.6931472, %v1508_v45 }
 0x28c   :  { %v515_v48 = vadd.f32 %v514_v47, %v507_v46 }
 0x28e   :  { %v2179_v49 = vadd.f32 1e-06, %v515_v48  ;;  %v1498_v48 = vld [vmem:[#allocation20 + $0x2] ss:$0 sm:$0xff] }
 0x290   :  { %v517_v50 = vmul.f32 %v2179_v49, %v2155_v2  ;;  %v1494_v2 = vld [vmem:[#allocation20] ss:$0 sm:$0xff] }
 0x292   :  { %519 = vrot.lane.b32.xlu0 %v517_v50, %s1973_s9 }
 0x304   :  { %v520_v54 = vpop.permute.xlu0 %519 }
 0x305   :  { %v522_v55 = vadd.f32 %v520_v54, %v2175_v36 }
 0x307   :  { %v523_v56 = vpack.c.bf16 %v522_v55, %v522_v55 }
 0x309   :  { %1258 = vmatmul.msk.bf16.vlgmr.msrb.gmra.mxu0 %vm327_vm0, %v523_v56 }
 0x386   :  { %v556_v59 = vpop.f32.mrf.mxu0 }
 0x387   :  { %v557_v60 = vadd.f32 %v1493_v58, %v556_v59 }
 0x389   :  { %v560_v61 = vmax.f32 %v557_v60, 0.0 }
 0x38b   :  { %v561_v62 = vpack.c.bf16 %v560_v61, %v560_v61 }
 0x38d   :  { %1275 = vmatmul.msk.bf16.vlgmr.msrb.gmra.mxu1 %vm382_vm1, %v561_v62  ;;  %v1451_v62 = vld [vmem:[#allocation19 + $0x78] sm:$0xff] }
 0x38e   :  { %v558_v63 = vpop.f32.mrf.mxu0  ;;  %929 = vmatpush.bf16.msra.mxu3 %v1451_v62 }
 0x38f   :  { %v1450_v63 = vld [vmem:[#allocation19 + $0x70] sm:$0xff] }
 0x392   :  { %930 = vmatpush.bf16.msra.mxu3 %v1450_v63 }
 0x396   :  { %931 = vmatpush.bf16.msra.mxu3 %v1449_v0 }
 0x39a   :  { %932 = vmatpush.bf16.msra.mxu3 %v1448_v1 }
 0x40a   :  { %v610_v3 = vpop.f32.mrf.mxu1 }
 0x40b   :  { %v611_v4 = vadd.f32 %v1494_v2, %v610_v3  ;;  %v1499_v2 = vld [vmem:[#allocation17 + $0x3] ss:$0 sm:$0xff] }
 0x40d   :  { %619 = vrot.lane.b32.xlu0 %v611_v4, %s1973_s9  ;;  %1509 = vtanh.f32 %v611_v4 }
 0x412   :  { %v612_v5 = vpop.f32.mrf.mxu1 }
 0x413   :  { %v2188_v9 = vpop.eup %1509 }
 0x414   :  { %v615_v10 = vmul.f32 1.442695, %v2188_v9 }
 0x416   :  { %1511 = vpow2.f32 %v615_v10 }
 0x41c   :  { %v1512_v11 = vpop.eup %1511 }
 0x41d   :  { %v617_v12 = vmul.f32 %v1512_v11, %v522_v55 }
 0x47f   :  { %v620_v13 = vpop.permute.xlu0 %619 }
 0x480   :  { %v622_v14 = vadd.f32 %v620_v13, %v617_v12  ;;  %v623_v13 = vsel %vm327_vm0, %v2188_v9, 0.0  ;;  %v1457_v9 = vld [vmem:[#allocation25 + $0x18] sm:$0xff] }
 0x481   :  { %1033 = vmatpush.bf16.msrb.mxu1 %v1457_v9 }
 0x482   :  { %v627_v15 = vpack.c.bf16 %v622_v14, %v622_v14 }
 0x484   :  { %1284 = vmatmul.msk.bf16.vlgmr.msrb.gmra.mxu2 %vm327_vm0, %v627_v15  ;;  %v1452_v15 = vld [vmem:[#allocation22] sm:$0xff] }
 0x485   :  { %1034 = vmatpush.bf16.msrb.mxu1 %v1456_v24 }
 0x507   :  { %v662_v18 = vpop.f32.mrf.mxu2 }
 0x508   :  { %v663_v19 = vadd.f32 %v1495_v17, %v662_v18 }
 0x50a   :  { %v666_v20 = vmax.f32 %v663_v19, 0.0 }
 0x50c   :  { %v667_v21 = vpack.c.bf16 %v666_v20, %v666_v20 }
 0x50e   :  { %1301 = vmatmul.msk.bf16.vlgmr.msrb.gmra.mxu3 %vm382_vm1, %v667_v21 }
 0x50f   :  { %v664_v22 = vpop.f32.mrf.mxu2 }
 0x591   :  { %v718_v25 = vpop.f32.mrf.mxu3 }
 0x592   :  { %v719_v26 = vadd.f32 %v1496_v23, %v718_v25  ;;  %v1455_v25 = vld [vmem:[#allocation25 + $0x8] sm:$0xff] }
 0x593   :  { %1035 = vmatpush.bf16.msrb.mxu1 %v1455_v25 }
 0x594   :  { %1513 = vtanh.f32 %v719_v26  ;;  %727 = vrot.lane.b32.xlu1 %v719_v26, %s1973_s9  ;;  %v1454_v26 = vld [vmem:[#allocation25] sm:$0xff] }
 0x597   :  { %1036 = vmatpush.bf16.msrb.mxu1 %v1454_v26 }
 0x599   :  { %v720_v28 = vpop.f32.mrf.mxu3 }
 0x59a   :  { %v1514_v29 = vpop.eup %1513  ;;  %v1459_v28 = vld [vmem:[%s2264_s17 + $0x8] sm:$0xff] }
 0x59b   :  { %v731_v30 = vsel %vm327_vm0, %v1514_v29, 0.0  ;;  %v723_v31 = vmul.f32 1.442695, %v1514_v29  ;;  %v1501_v29 = vld [vmem:[#allocation23] ss:$0 sm:$0xff] }
 0x59c   :  { %732 = vadd.xlane.f32.xlu0 %v731_v30 }
 0x59d   :  { %1515 = vpow2.f32 %v723_v31 }
 0x5a3   :  { %v1516_v32 = vpop.eup %1515 }
 0x5a4   :  { %v725_v35 = vmul.f32 %v1516_v32, %v622_v14  ;;  %v1453_v14 = vld [vmem:[#allocation22 + $0x8] sm:$0xff] }
 0x5a5   :  { %981 = vmatpush.bf16.msrb.mxu0 %v1453_v14 }
 0x5a9   :  { %982 = vmatpush.bf16.msrb.mxu0 %v1452_v15 }
 0x5b0   :  { %1158 = vrot.lane.b32.xlu0 %v2179_v49, %s1974_s2 }
 0x606   :  { %v728_v37 = vpop.permute.xlu1 %727 }
 0x607   :  { %v730_v38 = vadd.f32 %v728_v37, %v725_v35  ;;  %v1458_v35 = vld [vmem:[%s2264_s17] sm:$0xff]  ;;  %v1465_v37 = vld [vmem:[%s2266_s19 + $0x18] sm:$0xff] }
 0x608   :  { %1141 = vmatpush.bf16.msrb.mxu3 %v1465_v37 }
 0x609   :  { %v735_v40 = vpack.c.bf16 %v730_v38, %v730_v38 }
 0x60b   :  { %1310 = vmatmul.msk.bf16.vlgmr.msra.gmra.mxu0 %vm327_vm0, %v735_v40  ;;  %v1502_v40 = vld [vmem:[#allocation26] ss:$0 sm:$0xff] }
 0x688   :  { %v770_v43 = vpop.f32.mrf.mxu0 }
 0x689   :  { %v771_v44 = vadd.f32 %v1497_v42, %v770_v43 }
 0x68b   :  { %v774_v45 = vmax.f32 %v771_v44, 0.0 }
 0x68d   :  { %v775_v46 = vpack.c.bf16 %v774_v45, %v774_v45 }
 0x68f   :  { %1327 = vmatmul.msk.bf16.vlgmr.msra.gmra.mxu1 %vm382_vm1, %v775_v46  ;;  %v1462_v46 = vld [vmem:[%s2266_s19] sm:$0xff] }
 0x690   :  { %v772_v47 = vpop.f32.mrf.mxu0 }
 0x691   :  { %v1503_v47 = vld [vmem:[%s2265_s18] ss:$0 sm:$0xff]  ;;  %s1975_s18 = smov [#allocation28]  }
 0x70c   :  { %v826_v49 = vpop.f32.mrf.mxu1 }
 0x70d   :  { %v827_v50 = vadd.f32 %v1498_v48, %v826_v49 }
 0x70f   :  { %835 = vrot.lane.b32.xlu1 %v827_v50, %s1973_s9  ;;  %1517 = vtanh.f32 %v827_v50 }
 0x714   :  { %v828_v51 = vpop.f32.mrf.mxu1 }
 0x715   :  { %v1518_v54 = vpop.eup %1517 }
 0x716   :  { %v839_v55 = vsel %vm327_vm0, %v1518_v54, 0.0  ;;  %v831_v56 = vmul.f32 1.442695, %v1518_v54 }
 0x718   :  { %1519 = vpow2.f32 %v831_v56  ;;  %v1504_v56 = vld [vmem:[%s2267_s20] ss:$0 sm:$0xff] }
 0x71e   :  { %v1520_v57 = vpop.eup %1519 }
 0x71f   :  { %v833_v58 = vmul.f32 %v1520_v57, %v730_v38  ;;  %v1464_v38 = vld [vmem:[%s2266_s19 + $0x10] sm:$0xff]  ;;  %s1170_s19 = sshll.u32 %s1975_s18, 4  ;;  %s1171_s19 = int_to_ptr.vmem [resolvable:$true] %s1170_s19 }
 0x720   :  { %1142 = vmatpush.bf16.msrb.mxu3 %v1464_v38 }
 0x724   :  { %1143 = vmatpush.bf16.msrb.mxu3 %v1463_v39 }
 0x728   :  { %1144 = vmatpush.bf16.msrb.mxu3 %v1462_v46 }
 0x739   :  { %840 = vadd.xlane.f32.xlu1 %v839_v55  ;;  %v733_v55 = vpop.xlane.xlu0 %732 }
 0x741   :  { %v1159_v63 = vpop.permute.xlu0 %1158 }
 0x781   :  { %v836_v59 = vpop.permute.xlu1 %835 }
 0x782   :  { %v838_v60 = vadd.f32 %v836_v59, %v833_v58 }
 0x784   :  { %v843_v61 = vpack.c.bf16 %v838_v60, %v838_v60 }
 0x786   :  { %1336 = vmatmul.msk.bf16.vlgmr.msra.gmra.mxu2 %vm327_vm0, %v843_v61 }
 0x7ac   :  { %v841_v59 = vpop.xlane.xlu1 %840 }
 0x809   :  { %v878_v3 = vpop.f32.mrf.mxu2 }
 0x80a   :  { %v879_v4 = vadd.f32 %v1499_v2, %v878_v3 }
 0x80c   :  { %v882_v5 = vmax.f32 %v879_v4, 0.0 }
 0x80e   :  { %v883_v6 = vpack.c.bf16 %v882_v5, %v882_v5 }
 0x810   :  { %1353 = vmatmul.msk.bf16.vlgmr.msra.gmra.mxu3 %vm382_vm1, %v883_v6 }
 0x811   :  { %v880_v7 = vpop.f32.mrf.mxu2 }
 0x893   :  { %v934_v10 = vpop.f32.mrf.mxu3 }
 0x894   :  { %v935_v11 = vadd.f32 %v1500_v8, %v934_v10 }
 0x896   :  { %943 = vrot.lane.b32.xlu2 %v935_v11, %s1973_s9  ;;  %1521 = vtanh.f32 %v935_v11 }
 0x89b   :  { %v936_v12 = vpop.f32.mrf.mxu3 }
 0x89c   :  { %v1522_v16 = vpop.eup %1521 }
 0x89d   :  { %v947_v17 = vsel %vm327_vm0, %v1522_v16, 0.0  ;;  %v939_v18 = vmul.f32 1.442695, %v1522_v16 }
 0x89f   :  { %1523 = vpow2.f32 %v939_v18 }
 0x8a5   :  { %v1524_v19 = vpop.eup %1523 }
 0x8a6   :  { %v941_v20 = vmul.f32 %v1524_v19, %v838_v60 }
 0x8bf   :  { %624 = vadd.xlane.f32.xlu2 %v623_v13 }
 0x8c7   :  { %948 = vadd.xlane.f32.xlu2 %v947_v17 }
 0x8df   :  { %1152 = vrot.lane.b32.xlu2 %v2175_v36, %s1974_s2  ;;  %v1461_v36 = vld [vmem:[%s2264_s17 + $0x18] sm:$0xff] }
 0x8e0   :  { %1087 = vmatpush.bf16.msrb.mxu2 %v1461_v36 }
 0x8e4   :  { %1088 = vmatpush.bf16.msrb.mxu2 %v1460_v27 }
 0x8e8   :  { %1089 = vmatpush.bf16.msrb.mxu2 %v1459_v28 }
 0x8ec   :  { %1090 = vmatpush.bf16.msrb.mxu2 %v1458_v35 }
 0x8f0   :  { %v944_v21 = vpop.permute.xlu2 %943 }
 0x8f1   :  { %v946_v22 = vadd.f32 %v944_v21, %v941_v20 }
 0x8f3   :  { %v951_v23 = vpack.c.bf16 %v946_v22, %v946_v22 }
 0x8f5   :  { %1362 = vmatmul.msk.bf16.vlgmr.msrb.gmra.mxu0 %vm327_vm0, %v951_v23 }
 0x932   :  { %v625_v53 = vpop.xlane.xlu2 %624 }
 0x933   :  { %v734_v57 = vadd.f32 %v733_v55, %v625_v53 }
 0x935   :  { %v842_v61 = vadd.f32 %v841_v59, %v734_v57 }
 0x93a   :  { %v949_v54 = vpop.xlane.xlu2 %948 }
 0x93b   :  { %v950_v0 = vadd.f32 %v949_v54, %v842_v61 }
 0x942   :  { %v1153_v62 = vpop.permute.xlu2 %1152 }
 0x972   :  { %v984_v30 = vpop.f32.mrf.mxu0 }
 0x973   :  { %v985_v31 = vadd.f32 %v1501_v29, %v984_v30 }
 0x975   :  { %v988_v32 = vmax.f32 %v985_v31, 0.0 }
 0x977   :  { %v989_v33 = vpack.c.bf16 %v988_v32, %v988_v32 }
 0x979   :  { %1379 = vmatmul.msk.bf16.vlgmr.msrb.gmra.mxu1 %vm382_vm1, %v989_v33 }
 0x97a   :  { %v986_v34 = vpop.f32.mrf.mxu0 }
 0x9f6   :  { %v1038_v41 = vpop.f32.mrf.mxu1 }
 0x9f7   :  { %v1039_v42 = vadd.f32 %v1502_v40, %v1038_v41 }
 0x9f9   :  { %v1042_v43 = vmax.f32 %v1039_v42, 0.0 }
 0x9fb   :  { %v1043_v44 = vpack.c.bf16 %v1042_v43, %v1042_v43 }
 0x9fd   :  { %1396 = vmatmul.msk.bf16.vlgmr.msrb.gmra.mxu2 %vm382_vm1, %v1043_v44 }
 0x9fe   :  { %v1040_v45 = vpop.f32.mrf.mxu1 }
 0xa80   :  { %v1092_v48 = vpop.f32.mrf.mxu2 }
 0xa81   :  { %v1093_v49 = vadd.f32 %v1503_v47, %v1092_v48 }
 0xa83   :  { %v1096_v50 = vmax.f32 %v1093_v49, 0.0 }
 0xa85   :  { %v1097_v51 = vpack.c.bf16 %v1096_v50, %v1096_v50 }
 0xa87   :  { %1413 = vmatmul.msk.bf16.vlgmr.msrb.gmra.mxu3 %vm382_vm1, %v1097_v51 }
 0xa88   :  { %v1094_v52 = vpop.f32.mrf.mxu2 }
 0xb0a   :  { %v1146_v58 = vpop.f32.mrf.mxu3 }
 0xb0b   :  { %v1147_v60 = vadd.f32 %v1504_v56, %v1146_v58 }
 0xb0d   :  { %1150 = vst.msk [vmem:[#allocation28] sm:$0xff] %vm327_vm0, %v1147_v60 }
 0xb0e   :  { %1156 = vst.msk [vmem:[#allocation28] sm:$0xff] %vm1155_vm2, %v1153_v62 }
 0xb0f   :  { %1162 = vst.msk [vmem:[#allocation28] sm:$0xff] %vm1161_vm3, %v1159_v63 }
 0xb10   :  { %1164 = vst.msk [vmem:[#allocation28] sm:$0xff] %vm1163_vm4, %v950_v0 }
 0xb11   :  { %1175 = dma.vmem_to_hbm [thread:$0]  %s1171_s19, 128, %s1173_s25, [#allocation4]  }
 0xb12   :  { %v1148_v1 = vpop.f32.mrf.mxu3 }
 0xb13   :  { %1951 = dma.done.wait [#allocation4], 128  }
 0xb14   :  { %1952 = vsyncadd [#allocation4], 4294967168 }
 0xb15   :  { %1180 = vsyncpa [#allocation3], 1 }
 0xb16   :  { %1181 = vsyncpa [#allocation6], 1 }
 0xb17   :  { %1182 = vsyncpa [#allocation9], 1 }
 0xb18   :  { %1183 = vsyncpa [#allocation12], 1 }
 0xb19   :  { %1184 = vsyncpa [#allocation15], 1 }
 0xb1a   :  { %1185 = vsyncpa [#allocation18], 1 }
 0xb1b   :  { %1186 = vsyncpa [#allocation21], 1 }
 0xb1c   :  { %1187 = vsyncpa [#allocation24], 1 }
 0xb1d   :  { %1188 = vsyncpa [#allocation27], 1 }
 0xb1e   :  { %1189 = vsyncpa [#allocation4], 1 }

// kernel: tpu_custom_call.1
= control target key start
LH: loop header
LB: loop body
LE: loop exit
PB: predicated region body
PF: predicated region fallthrough
CT: control target
= control target key end

     0   :  { %s2247_s0 = inlined_call_operand.hbm [shape: f32[8,64], index: 0, kind: input, shape index: {}]   ;;  %s2248_s1 = inlined_call_operand.hbm [shape: bf16[32,64], index: 1, kind: input, shape index: {}]   ;;  %s2249_s2 = inlined_call_operand.hbm [shape: f32[1,64], index: 2, kind: input, shape index: {}]   ;;  %s2250_s3 = inlined_call_operand.vmem [shape: bf16[64,64], index: 3, kind: input, shape index: {}]   ;;  %s2251_s4 = inlined_call_operand.hbm [shape: f32[1,64], index: 4, kind: input, shape index: {}]   ;;  %s2252_s5 = inlined_call_operand.hbm [shape: bf16[64,64], index: 5, kind: input, shape index: {}]   ;;  %s2253_s6 = inlined_call_operand.hbm [shape: f32[1,64], index: 6, kind: input, shape index: {}]   ;;  %s2254_s7 = inlined_call_operand.hbm [shape: bf16[64,64], index: 7, kind: input, shape index: {}]   ;;  %s2255_s8 = inlined_call_operand.hbm [shape: f32[1,64], index: 8, kind: input, shape index: {}]   ;;  %s2256_s9 = inlined_call_operand.hbm [shape: bf16[4,32,64], index: 9, kind: input, shape index: {}]   ;;  %s2257_s10 = inlined_call_operand.hbm [shape: f32[4,1,64], index: 10, kind: input, shape index: {}]   ;;  %s2258_s11 = inlined_call_operand.hbm [shape: bf16[4,64,64], index: 11, kind: input, shape index: {}]   ;;  %s2259_s12 = inlined_call_operand.hbm [shape: f32[4,1,64], index: 12, kind: input, shape index: {}]   ;;  %s2260_s13 = inlined_call_operand.hbm [shape: bf16[32,64], index: 13, kind: input, shape index: {}]   ;;  %s2261_s14 = inlined_call_operand.hbm [shape: f32[1,64], index: 14, kind: input, shape index: {}]   ;;  %s2262_s15 = inlined_call_operand.hbm [shape: bf16[64,64], index: 15, kind: input, shape index: {}]   ;;  %s2263_s16 = inlined_call_operand.hbm [shape: f32[1,64], index: 16, kind: input, shape index: {}]   ;;  %s2264_s17 = inlined_call_operand.vmem [shape: bf16[64,64], index: 17, kind: input, shape index: {}]   ;;  %s2265_s18 = inlined_call_operand.vmem [shape: f32[1,64], index: 18, kind: input, shape index: {}]   ;;  %s2266_s19 = inlined_call_operand.vmem [shape: bf16[64,32], index: 19, kind: input, shape index: {}]   ;;  %s2267_s20 = inlined_call_operand.vmem [shape: f32[1,32], index: 20, kind: input, shape index: {}]   ;;  %s2268_s21 = inlined_call_operand.hbm [shape: f32[8,128], index: 21, kind: output, shape index: {}]  }
   0x1   :  { %2274 = sst [smem:[#allocation39_spill]] %s2247_s0 }
   0x2   :  { %2275 = sst [smem:[#allocation40_spill]] %s2248_s1 }
   0x3   :  { %2276 = sst [smem:[#allocation41_spill]] %s2249_s2 }
   0x4   :  { %2277 = sst [smem:[#allocation42_spill]] %s2250_s3 }
   0x5   :  { %2278 = sst [smem:[#allocation43_spill]] %s2251_s4 }
   0x6   :  { %2279 = sst [smem:[#allocation44_spill]] %s2252_s5 }
   0x7   :  { %26 = vsyncpa [#allocation3], 0 }
   0x8   :  { %27 = vsyncpa [#allocation6], 0 }
   0x9   :  { %28 = vsyncpa [#allocation9], 0 }
   0xa   :  { %29 = vsyncpa [#allocation12], 0 }
   0xb   :  { %30 = vsyncpa [#allocation15], 0 }
   0xc   :  { %31 = vsyncpa [#allocation18], 0 }
   0xd   :  { %32 = vsyncpa [#allocation21], 0 }
   0xe   :  { %33 = vsyncpa [#allocation24], 0 }
   0xf   :  { %34 = vsyncpa [#allocation27], 0  ;;  %s2280_s26 = sld [smem:[#allocation40_spill]] }
  0x15   :  { %s51_s27 = sshll.u32 %s2280_s26, 4  ;;  %s52_s27 = int_to_ptr.hbm [resolvable:$true] %s51_s27 }
  0x16   :  { %35 = vsyncpa [#allocation4], 0  ;;  %s1953_s3 = smov [#allocation5]   ;;  %s2281_s4 = sld [smem:[#allocation43_spill]] }
  0x17   :  { %s53_s28 = sshll.u32 %s1953_s3, 4  ;;  %s2270_s5 = smov 64   ;;  %s54_s28 = int_to_ptr.vmem [resolvable:$true] %s53_s28 }
  0x18   :  { %s2272_s22 = smov 4   ;;  %s1956_s23 = smov [#allocation8]  }
  0x19   :  { %59 = dma.hbm_to_vmem [thread:$0]  %s52_s27, 256, %s54_s28, [#allocation6], %s2270_s5, %s2270_s5, %s2272_s22  }
  0x1a   :  { %s80_s1 = sshll.u32 %s1956_s23, 4  ;;  %s102_s25 = sshll.u32 %s2253_s6, 4  ;;  %s81_s1 = int_to_ptr.vmem [resolvable:$true] %s80_s1  ;;  %s103_s25 = int_to_ptr.hbm [resolvable:$true] %s102_s25 }
  0x1b   :  { %s126_s29 = sshll.u32 %s2255_s8, 4  ;;  %s1957_s0 = smov [#allocation11]   ;;  %s127_s29 = int_to_ptr.hbm [resolvable:$true] %s126_s29 }
  0x1c   :  { %s78_s30 = sshll.u32 %s2281_s4, 4  ;;  %s104_s4 = sshll.u32 %s1957_s0, 4  ;;  %s79_s30 = int_to_ptr.hbm [resolvable:$true] %s78_s30  ;;  %s105_s4 = int_to_ptr.vmem [resolvable:$true] %s104_s4 }
  0x1d   :  { %83 = dma.hbm_to_vmem [thread:$0]  %s79_s30, 16, %s81_s1, [#allocation9]  }
  0x1e   :  { %107 = dma.hbm_to_vmem [thread:$0]  %s103_s25, 16, %s105_s4, [#allocation12]  }
  0x1f   :  { %s1958_s27 = smov [#allocation14]   ;;  %s149_s22 = sshll.u32 %s2257_s10, 4  ;;  %s150_s22 = int_to_ptr.hbm [resolvable:$true] %s149_s22 }
  0x20   :  { %s128_s28 = sshll.u32 %s1958_s27, 4  ;;  %s1959_s6 = smov [#allocation17]   ;;  %s129_s28 = int_to_ptr.vmem [resolvable:$true] %s128_s28 }
  0x21   :  { %131 = dma.hbm_to_vmem [thread:$0]  %s127_s29, 16, %s129_s28, [#allocation15]  }
  0x22   :  { %s151_s30 = sshll.u32 %s1959_s6, 4  ;;  %s175_s8 = sshll.u32 %s2259_s12, 4  ;;  %s152_s30 = int_to_ptr.vmem [resolvable:$true] %s151_s30  ;;  %s176_s8 = int_to_ptr.hbm [resolvable:$true] %s175_s8 }
  0x23   :  { %s1960_s2 = smov 16   ;;  %s1961_s26 = smov 1  }
  0x24   :  { %157 = dma.hbm_to_vmem [thread:$0]  %s150_s22, 64, %s152_s30, [#allocation18], %s1960_s2, %s1960_s2, %s1961_s26  }
  0x25   :  { %s1962_s25 = smov [#allocation20]   ;;  %s202_s10 = sshll.u32 %s2261_s14, 4  ;;  %s203_s10 = int_to_ptr.hbm [resolvable:$true] %s202_s10 }
  0x26   :  { %s177_s3 = sshll.u32 %s1962_s25, 4  ;;  %s2282_s27 = sld [smem:[#allocation39_spill]]  ;;  %s178_s3 = int_to_ptr.vmem [resolvable:$true] %s177_s3 }
  0x27   :  { %183 = dma.hbm_to_vmem [thread:$0]  %s176_s8, 64, %s178_s3, [#allocation21], %s1960_s2, %s1960_s2, %s1961_s26  }
  0x28   :  { %s1963_s23 = smov [#allocation23]   ;;  %s1964_s12 = smov [#allocation2]  }
  0x29   :  { %s204_s6 = sshll.u32 %s1963_s23, 4  ;;  %s43_s22 = sshll.u32 %s1964_s12, 4  ;;  %s205_s6 = int_to_ptr.vmem [resolvable:$true] %s204_s6  ;;  %s44_s22 = int_to_ptr.vmem [resolvable:$true] %s43_s22 }
  0x2a   :  { %207 = dma.hbm_to_vmem [thread:$0]  %s203_s10, 16, %s205_s6, [#allocation24]  }
  0x2b   :  { %s2283_s24 = sld [smem:[#allocation41_spill]]  ;;  %s1965_s3 = smov [#allocation7]  }
  0x2c   :  { %s41_s28 = sshll.u32 %s2282_s27, 4  ;;  %s2284_s2 = sld [smem:[#allocation44_spill]]  ;;  %s42_s28 = int_to_ptr.hbm [resolvable:$true] %s41_s28 }
  0x2d   :  { %46 = dma.hbm_to_vmem [thread:$0]  %s42_s28, 128, %s44_s22, [#allocation3]  }
  0x2e   :  { %s67_s0 = sshll.u32 %s1965_s3, 4  ;;  %s1966_s4 = smov [#allocation10]   ;;  %s68_s0 = int_to_ptr.vmem [resolvable:$true] %s67_s0 }
  0x2f   :  { %s90_s10 = sshll.u32 %s1966_s4, 4  ;;  %s112_s27 = sshll.u32 %s2254_s7, 4  ;;  %s91_s10 = int_to_ptr.vmem [resolvable:$true] %s90_s10  ;;  %s113_s27 = int_to_ptr.hbm [resolvable:$true] %s112_s27 }
  0x30   :  { %s2285_s23 = smov 4   ;;  %s2286_s6 = smov 64  }
  0x31   :  { %s65_s25 = sshll.u32 %s2283_s24, 4  ;;  %s136_s22 = sshll.u32 %s2256_s9, 4  ;;  %s66_s25 = int_to_ptr.hbm [resolvable:$true] %s65_s25  ;;  %s137_s22 = int_to_ptr.hbm [resolvable:$true] %s136_s22 }
  0x32   :  { %s88_s26 = sshll.u32 %s2284_s2, 4  ;;  %s1967_s30 = smov [#allocation13]   ;;  %s89_s26 = int_to_ptr.hbm [resolvable:$true] %s88_s26 }
  0x33   :  { %70 = dma.hbm_to_vmem [thread:$0]  %s66_s25, 16, %s68_s0, [#allocation6]  }
  0x34   :  { %96 = dma.hbm_to_vmem [thread:$0]  %s89_s26, 512, %s91_s10, [#allocation9], %s2286_s6, %s2286_s6, %s2285_s23  }
  0x35   :  { %s114_s1 = sshll.u32 %s1967_s30, 4  ;;  %s1968_s24 = smov [#allocation16]   ;;  %s115_s1 = int_to_ptr.vmem [resolvable:$true] %s114_s1 }
  0x36   :  { %120 = dma.hbm_to_vmem [thread:$0]  %s113_s27, 512, %s115_s1, [#allocation12], %s2286_s6, %s2286_s6, %s2285_s23  }
  0x37   :  { %s138_s7 = sshll.u32 %s1968_s24, 4  ;;  %s162_s8 = sshll.u32 %s2258_s11, 4  ;;  %s139_s7 = int_to_ptr.vmem [resolvable:$true] %s138_s7  ;;  %s163_s8 = int_to_ptr.hbm [resolvable:$true] %s162_s8 }
  0x38   :  { %144 = dma.hbm_to_vmem [thread:$0]  %s137_s22, 1024, %s139_s7, [#allocation15], %s2286_s6, %s2286_s6, %s2285_s23  }
  0x39   :  { %s188_s26 = sshll.u32 %s2260_s13, 4  ;;  %s1969_s3 = smov [#allocation19]   ;;  %s189_s26 = int_to_ptr.hbm [resolvable:$true] %s188_s26 }
  0x3a   :  { %s164_s0 = sshll.u32 %s1969_s3, 4  ;;  %s1970_s4 = smov [#allocation22]   ;;  %s165_s0 = int_to_ptr.vmem [resolvable:$true] %s164_s0 }
  0x3b   :  { %170 = dma.hbm_to_vmem [thread:$0]  %s163_s8, 2048, %s165_s0, [#allocation18], %s2286_s6, %s2286_s6, %s2285_s23  }
  0x3c   :  { %s190_s11 = sshll.u32 %s1970_s4, 4  ;;  %s212_s29 = sshll.u32 %s2262_s15, 4  ;;  %s191_s11 = int_to_ptr.vmem [resolvable:$true] %s190_s11  ;;  %s213_s29 = int_to_ptr.hbm [resolvable:$true] %s212_s29 }
  0x3d   :  { %196 = dma.hbm_to_vmem [thread:$0]  %s189_s26, 256, %s191_s11, [#allocation21], %s2286_s6, %s2286_s6, %s2285_s23  }
  0x3e   :  { %s226_s28 = sshll.u32 %s2263_s16, 4  ;;  %s1971_s12 = smov [#allocation25]   ;;  %s227_s28 = int_to_ptr.hbm [resolvable:$true] %s226_s28 }
  0x3f   :  { %s214_s22 = sshll.u32 %s1971_s12, 4  ;;  %s1972_s30 = smov [#allocation26]   ;;  %s215_s22 = int_to_ptr.vmem [resolvable:$true] %s214_s22 }
  0x40   :  { %220 = dma.hbm_to_vmem [thread:$0]  %s213_s29, 512, %s215_s22, [#allocation24], %s2286_s6, %s2286_s6, %s2285_s23  }
  0x41   :  { %s228_s15 = sshll.u32 %s1972_s30, 4  ;;  %s229_s15 = int_to_ptr.vmem [resolvable:$true] %s228_s15 }
  0x42   :  { %231 = dma.hbm_to_vmem [thread:$0]  %s227_s28, 16, %s229_s15, [#allocation27]  }
  0x43   :  { %1933 = dma.done.wait [#allocation3], 128  }
  0x44   :  { %1934 = vsyncadd [#allocation3], 4294967168 }
  0x45   :  { %1935 = dma.done.wait [#allocation6], 272  }
  0x46   :  { %1936 = vsyncadd [#allocation6], 4294967024 }
  0x47   :  { %1937 = dma.done.wait [#allocation9], 528  }
  0x48   :  { %1938 = vsyncadd [#allocation9], 4294966768 }
  0x49   :  { %1939 = dma.done.wait [#allocation12], 528  }
  0x4a   :  { %1940 = vsyncadd [#allocation12], 4294966768 }
  0x4b   :  { %1941 = dma.done.wait [#allocation15], 1040  }
  0x4c   :  { %1942 = vsyncadd [#allocation15], 4294966256 }
  0x4d   :  { %1943 = dma.done.wait [#allocation18], 2112  }
  0x4e   :  { %1944 = vsyncadd [#allocation18], 4294965184 }
  0x4f   :  { %1945 = dma.done.wait [#allocation21], 320  }
  0x50   :  { %1946 = vsyncadd [#allocation21], 4294966976 }
  0x51   :  { %1947 = dma.done.wait [#allocation24], 528  }
  0x52   :  { %1948 = vsyncadd [#allocation24], 4294966768 }
  0x53   :  { %1949 = dma.done.wait [#allocation27], 16  }
  0x54   :  { %1950 = vsyncadd [#allocation27], 4294967280  ;;  %v1415_v0 = vld [vmem:[#allocation5 + $0x8] sm:$0xff]  ;;  %v1414_v1 = vld [vmem:[#allocation5] sm:$0xff]  ;;  %s2287_s6 = sld [smem:[#allocation42_spill]]  ;;  %vm327_vm0 = vcmask 261120  }
  0x55   :  { %v2155_v2 = vld [vmem:[#allocation2] sm:$0xff]  ;;  %337 = vmatpush.bf16.msra.mxu0 %v1415_v0  ;;  %v1423_v8 = vld [vmem:[#allocation10 + $0x18] sm:$0xff]  ;;  %v1422_v9 = vld [vmem:[#allocation10 + $0x10] sm:$0xff]  ;;  %vm382_vm1 = vcmask 523264   ;;  %s1973_s9 = smov 96   ;;  %s1974_s2 = smov 32  }
  0x56   :  { %v306_v5 = vpack.c.bf16 %v2155_v2, %v2155_v2  ;;  %444 = vmatpush.bf16.msra.mxu2 %v1423_v8  ;;  %v1489_v10 = vld [vmem:[#allocation7] ss:$0 sm:$0xff]  ;;  %v1421_v16 = vld [vmem:[#allocation10 + $0x8] sm:$0xff]  ;;  %v1420_v17 = vld [vmem:[#allocation10] sm:$0xff]  ;;  %vm1155_vm2 = vcmask 523520   ;;  %s1172_s25 = sshll.u32 %s2268_s21, 4  ;;  %s1173_s25 = int_to_ptr.hbm [resolvable:$true] %s1172_s25 }
  0x57   :  { %v1427_v18 = vld [vmem:[#allocation13 + $0x18] sm:$0xff]  ;;  %v1426_v19 = vld [vmem:[#allocation13 + $0x10] sm:$0xff]  ;;  %v1425_v26 = vld [vmem:[#allocation13 + $0x8] sm:$0xff]  ;;  %vm1161_vm3 = vcmask 785920   ;;  %vm1163_vm4 = vcmask 794368  }
  0x58   :  { %498 = vmatpush.bf16.msra.mxu3 %v1427_v18  ;;  %v1490_v20 = vld [vmem:[#allocation8] ss:$0 sm:$0xff]  ;;  %v1424_v27 = vld [vmem:[#allocation13] sm:$0xff]  ;;  %v1491_v28 = vld [vmem:[#allocation11] ss:$0 sm:$0xff] }
  0x59   :  { %338 = vmatpush.bf16.msra.mxu0 %v1414_v1  ;;  %v1492_v34 = vld [vmem:[#allocation14] ss:$0 sm:$0xff]  ;;  %v1429_v37 = vld [vmem:[#allocation16 + $0x8] sm:$0xff]  ;;  %v1428_v39 = vld [vmem:[#allocation16] sm:$0xff] }
  0x5a   :  { %v1419_v3 = vld [vmem:[%s2287_s6 + $0x18] sm:$0xff]  ;;  %v1418_v4 = vld [vmem:[%s2287_s6 + $0x10] sm:$0xff]  ;;  %v1417_v6 = vld [vmem:[%s2287_s6 + $0x8] sm:$0xff]  ;;  %445 = vmatpush.bf16.msra.mxu2 %v1422_v9 }
  0x5b   :  { %390 = vmatpush.bf16.msra.mxu1 %v1419_v3  ;;  %v1416_v7 = vld [vmem:[%s2287_s6] sm:$0xff]  ;;  %v1432_v52 = vld [vmem:[#allocation19 + $0x10] sm:$0xff]  ;;  %v1431_v53 = vld [vmem:[#allocation19 + $0x8] sm:$0xff] }
  0x5c   :  { %1198 = vmatmul.msk.bf16.vlgmr.msra.gmra.mxu0 %vm327_vm0, %v306_v5  ;;  %499 = vmatpush.bf16.msra.mxu3 %v1426_v19  ;;  %v1433_v51 = vld [vmem:[#allocation19 + $0x18] sm:$0xff]  ;;  %v1430_v57 = vld [vmem:[#allocation19] sm:$0xff]  ;;  %v1434_v1 = vld [vmem:[#allocation16 + $0x10] sm:$0xff] }
  0x5d   :  { %553 = vmatpush.bf16.msrb.mxu0 %v1429_v37  ;;  %v1493_v58 = vld [vmem:[#allocation17] ss:$0 sm:$0xff]  ;;  %v1435_v0 = vld [vmem:[#allocation16 + $0x18] sm:$0xff]  ;;  %v1437_v8 = vld [vmem:[#allocation19 + $0x28] sm:$0xff] }
  0x5e   :  { %446 = vmatpush.bf16.msra.mxu2 %v1421_v16  ;;  %v1436_v16 = vld [vmem:[#allocation19 + $0x20] sm:$0xff] }
  0x5f   :  { %391 = vmatpush.bf16.msra.mxu1 %v1418_v4 }
  0x60   :  { %500 = vmatpush.bf16.msra.mxu3 %v1425_v26 }
  0x61   :  { %554 = vmatpush.bf16.msrb.mxu0 %v1428_v39  ;;  %v1443_v39 = vld [vmem:[#allocation19 + $0x48] sm:$0xff] }
  0x62   :  { %447 = vmatpush.bf16.msra.mxu2 %v1420_v17  ;;  %v1495_v17 = vld [vmem:[#allocation17 + $0x1] ss:$0 sm:$0xff] }
  0x63   :  { %392 = vmatpush.bf16.msra.mxu1 %v1417_v6  ;;  %v1439_v6 = vld [vmem:[#allocation19 + $0x38] sm:$0xff] }
  0x64   :  { %501 = vmatpush.bf16.msra.mxu3 %v1424_v27  ;;  %v1440_v27 = vld [vmem:[#allocation16 + $0x20] sm:$0xff] }
  0x66   :  { %659 = vmatpush.bf16.msrb.mxu2 %v1435_v0  ;;  %v1449_v0 = vld [vmem:[#allocation19 + $0x68] sm:$0xff] }
  0x67   :  { %393 = vmatpush.bf16.msra.mxu1 %v1416_v7  ;;  %v1438_v7 = vld [vmem:[#allocation19 + $0x30] sm:$0xff] }
  0x68   :  { %713 = vmatpush.bf16.msrb.mxu3 %v1439_v6 }
  0x6a   :  { %660 = vmatpush.bf16.msrb.mxu2 %v1434_v1  ;;  %v1448_v1 = vld [vmem:[#allocation19 + $0x60] sm:$0xff] }
  0x6b   :  { %605 = vmatpush.bf16.msrb.mxu1 %v1433_v51 }
  0x6c   :  { %714 = vmatpush.bf16.msrb.mxu3 %v1438_v7 }
  0x6f   :  { %606 = vmatpush.bf16.msrb.mxu1 %v1432_v52  ;;  %v1447_v52 = vld [vmem:[#allocation16 + $0x38] sm:$0xff] }
  0x70   :  { %715 = vmatpush.bf16.msrb.mxu3 %v1437_v8  ;;  %v1500_v8 = vld [vmem:[#allocation20 + $0x3] ss:$0 sm:$0xff] }
  0x73   :  { %607 = vmatpush.bf16.msrb.mxu1 %v1431_v53  ;;  %v1446_v53 = vld [vmem:[#allocation16 + $0x30] sm:$0xff] }
  0x74   :  { %716 = vmatpush.bf16.msrb.mxu3 %v1436_v16 }
  0x77   :  { %608 = vmatpush.bf16.msrb.mxu1 %v1430_v57 }
  0xd9   :  { %v340_v11 = vpop.f32.mrf.mxu0 }
  0xda   :  { %v341_v12 = vadd.f32 %v1489_v10, %v340_v11 }
  0xdc   :  { %v344_v13 = vmax.f32 %v341_v12, 0.0 }
  0xde   :  { %v345_v14 = vpack.c.bf16 %v344_v13, %v344_v13 }
  0xe0   :  { %1215 = vmatmul.msk.bf16.vlgmr.msra.gmra.mxu1 %vm382_vm1, %v345_v14 }
  0xe1   :  { %v342_v15 = vpop.f32.mrf.mxu0 }
 0x15d   :  { %v395_v21 = vpop.f32.mrf.mxu1 }
 0x15e   :  { %v396_v22 = vadd.f32 %v1490_v20, %v395_v21 }
 0x160   :  { %v399_v23 = vmax.f32 %v396_v22, 0.0 }
 0x162   :  { %v400_v24 = vpack.c.bf16 %v399_v23, %v399_v23  ;;  %v1496_v23 = vld [vmem:[#allocation20 + $0x1] ss:$0 sm:$0xff] }
 0x164   :  { %1232 = vmatmul.msk.bf16.vlgmr.msra.gmra.mxu2 %vm382_vm1, %v400_v24  ;;  %v1441_v24 = vld [vmem:[#allocation16 + $0x28] sm:$0xff] }
 0x165   :  { %v397_v25 = vpop.f32.mrf.mxu1  ;;  %767 = vmatpush.bf16.msra.mxu0 %v1441_v24  ;;  %875 = vmatpush.bf16.msra.mxu2 %v1447_v52  ;;  %v1456_v24 = vld [vmem:[#allocation25 + $0x10] sm:$0xff] }
 0x169   :  { %768 = vmatpush.bf16.msra.mxu0 %v1440_v27  ;;  %876 = vmatpush.bf16.msra.mxu2 %v1446_v53  ;;  %v1460_v27 = vld [vmem:[%s2264_s17 + $0x10] sm:$0xff] }
 0x1e7   :  { %v449_v29 = vpop.f32.mrf.mxu2 }
 0x1e8   :  { %v450_v30 = vadd.f32 %v1491_v28, %v449_v29 }
 0x1ea   :  { %v453_v31 = vmax.f32 %v450_v30, 0.0 }
 0x1ec   :  { %v454_v32 = vpack.c.bf16 %v453_v31, %v453_v31 }
 0x1ee   :  { %1249 = vmatmul.msk.bf16.vlgmr.msra.gmra.mxu3 %vm382_vm1, %v454_v32 }
 0x1ef   :  { %v451_v33 = vpop.f32.mrf.mxu2 }
 0x1f0   :  { %v1445_v33 = vld [vmem:[#allocation19 + $0x58] sm:$0xff] }
 0x1f1   :  { %821 = vmatpush.bf16.msra.mxu1 %v1445_v33 }
 0x271   :  { %v503_v35 = vpop.f32.mrf.mxu3 }
 0x272   :  { %v2175_v36 = vadd.f32 %v1492_v34, %v503_v35  ;;  %v1444_v34 = vld [vmem:[#allocation19 + $0x50] sm:$0xff] }
 0x273   :  { %822 = vmatpush.bf16.msra.mxu1 %v1444_v34 }
 0x274   :  { %v508_v38 = vand.u32 2147483647, %v2175_v36  ;;  %v507_v46 = vmax.f32 %v2175_v36, 0.0 }
 0x276   :  { %v509_v40 = vsub.f32 0.0, %v508_v38 }
 0x277   :  { %823 = vmatpush.bf16.msra.mxu1 %v1443_v39  ;;  %v1463_v39 = vld [vmem:[%s2266_s19 + $0x8] sm:$0xff] }
 0x278   :  { %v510_v41 = vmul.f32 1.442695, %v509_v40 }
 0x279   :  { %v505_v42 = vpop.f32.mrf.mxu3 }
 0x27a   :  { %1505 = vpow2.f32 %v510_v41  ;;  %v1442_v41 = vld [vmem:[#allocation19 + $0x40] sm:$0xff]  ;;  %v1497_v42 = vld [vmem:[#allocation17 + $0x2] ss:$0 sm:$0xff] }
 0x27b   :  { %824 = vmatpush.bf16.msra.mxu1 %v1442_v41 }
 0x280   :  { %v1506_v43 = vpop.eup %1505 }
 0x281   :  { %v512_v44 = vadd.f32 1.0, %v1506_v43 }
 0x283   :  { %1507 = vlog2.f32 %v512_v44 }
 0x289   :  { %v1508_v45 = vpop.eup %1507 }
 0x28a   :  { %v514_v47 = vmul.f32 0.6931472, %v1508_v45 }
 0x28c   :  { %v515_v48 = vadd.f32 %v514_v47, %v507_v46 }
 0x28e   :  { %v2179_v49 = vadd.f32 1e-06, %v515_v48  ;;  %v1498_v48 = vld [vmem:[#allocation20 + $0x2] ss:$0 sm:$0xff] }
 0x290   :  { %v517_v50 = vmul.f32 %v2179_v49, %v2155_v2  ;;  %v1494_v2 = vld [vmem:[#allocation20] ss:$0 sm:$0xff] }
 0x292   :  { %519 = vrot.lane.b32.xlu0 %v517_v50, %s1973_s9 }
 0x304   :  { %v520_v54 = vpop.permute.xlu0 %519 }
 0x305   :  { %v522_v55 = vadd.f32 %v520_v54, %v2175_v36 }
 0x307   :  { %v523_v56 = vpack.c.bf16 %v522_v55, %v522_v55 }
 0x309   :  { %1258 = vmatmul.msk.bf16.vlgmr.msrb.gmra.mxu0 %vm327_vm0, %v523_v56 }
 0x386   :  { %v556_v59 = vpop.f32.mrf.mxu0 }
 0x387   :  { %v557_v60 = vadd.f32 %v1493_v58, %v556_v59 }
 0x389   :  { %v560_v61 = vmax.f32 %v557_v60, 0.0 }
 0x38b   :  { %v561_v62 = vpack.c.bf16 %v560_v61, %v560_v61 }
 0x38d   :  { %1275 = vmatmul.msk.bf16.vlgmr.msrb.gmra.mxu1 %vm382_vm1, %v561_v62  ;;  %v1451_v62 = vld [vmem:[#allocation19 + $0x78] sm:$0xff] }
 0x38e   :  { %v558_v63 = vpop.f32.mrf.mxu0  ;;  %929 = vmatpush.bf16.msra.mxu3 %v1451_v62 }
 0x38f   :  { %v1450_v63 = vld [vmem:[#allocation19 + $0x70] sm:$0xff] }
 0x392   :  { %930 = vmatpush.bf16.msra.mxu3 %v1450_v63 }
 0x396   :  { %931 = vmatpush.bf16.msra.mxu3 %v1449_v0 }
 0x39a   :  { %932 = vmatpush.bf16.msra.mxu3 %v1448_v1 }
 0x40a   :  { %v610_v3 = vpop.f32.mrf.mxu1 }
 0x40b   :  { %v611_v4 = vadd.f32 %v1494_v2, %v610_v3  ;;  %v1499_v2 = vld [vmem:[#allocation17 + $0x3] ss:$0 sm:$0xff] }
 0x40d   :  { %619 = vrot.lane.b32.xlu0 %v611_v4, %s1973_s9  ;;  %1509 = vtanh.f32 %v611_v4 }
 0x412   :  { %v612_v5 = vpop.f32.mrf.mxu1 }
 0x413   :  { %v2188_v9 = vpop.eup %1509 }
 0x414   :  { %v615_v10 = vmul.f32 1.442695, %v2188_v9 }
 0x416   :  { %1511 = vpow2.f32 %v615_v10 }
 0x41c   :  { %v1512_v11 = vpop.eup %1511 }
 0x41d   :  { %v617_v12 = vmul.f32 %v1512_v11, %v522_v55 }
 0x47f   :  { %v620_v13 = vpop.permute.xlu0 %619 }
 0x480   :  { %v622_v14 = vadd.f32 %v620_v13, %v617_v12  ;;  %v623_v13 = vsel %vm327_vm0, %v2188_v9, 0.0  ;;  %v1457_v9 = vld [vmem:[#allocation25 + $0x18] sm:$0xff] }
 0x481   :  { %1033 = vmatpush.bf16.msrb.mxu1 %v1457_v9 }
 0x482   :  { %v627_v15 = vpack.c.bf16 %v622_v14, %v622_v14 }
 0x484   :  { %1284 = vmatmul.msk.bf16.vlgmr.msrb.gmra.mxu2 %vm327_vm0, %v627_v15  ;;  %v1452_v15 = vld [vmem:[#allocation22] sm:$0xff] }
 0x485   :  { %1034 = vmatpush.bf16.msrb.mxu1 %v1456_v24 }
 0x507   :  { %v662_v18 = vpop.f32.mrf.mxu2 }
 0x508   :  { %v663_v19 = vadd.f32 %v1495_v17, %v662_v18 }
 0x50a   :  { %v666_v20 = vmax.f32 %v663_v19, 0.0 }
 0x50c   :  { %v667_v21 = vpack.c.bf16 %v666_v20, %v666_v20 }
 0x50e   :  { %1301 = vmatmul.msk.bf16.vlgmr.msrb.gmra.mxu3 %vm382_vm1, %v667_v21 }
 0x50f   :  { %v664_v22 = vpop.f32.mrf.mxu2 }
 0x591   :  { %v718_v25 = vpop.f32.mrf.mxu3 }
 0x592   :  { %v719_v26 = vadd.f32 %v1496_v23, %v718_v25  ;;  %v1455_v25 = vld [vmem:[#allocation25 + $0x8] sm:$0xff] }
 0x593   :  { %1035 = vmatpush.bf16.msrb.mxu1 %v1455_v25 }
 0x594   :  { %1513 = vtanh.f32 %v719_v26  ;;  %727 = vrot.lane.b32.xlu1 %v719_v26, %s1973_s9  ;;  %v1454_v26 = vld [vmem:[#allocation25] sm:$0xff] }
 0x597   :  { %1036 = vmatpush.bf16.msrb.mxu1 %v1454_v26 }
 0x599   :  { %v720_v28 = vpop.f32.mrf.mxu3 }
 0x59a   :  { %v1514_v29 = vpop.eup %1513  ;;  %v1459_v28 = vld [vmem:[%s2264_s17 + $0x8] sm:$0xff] }
 0x59b   :  { %v731_v30 = vsel %vm327_vm0, %v1514_v29, 0.0  ;;  %v723_v31 = vmul.f32 1.442695, %v1514_v29  ;;  %v1501_v29 = vld [vmem:[#allocation23] ss:$0 sm:$0xff] }
 0x59c   :  { %732 = vadd.xlane.f32.xlu0 %v731_v30 }
 0x59d   :  { %1515 = vpow2.f32 %v723_v31 }
 0x5a3   :  { %v1516_v32 = vpop.eup %1515 }
 0x5a4   :  { %v725_v35 = vmul.f32 %v1516_v32, %v622_v14  ;;  %v1453_v14 = vld [vmem:[#allocation22 + $0x8] sm:$0xff] }
 0x5a5   :  { %981 = vmatpush.bf16.msrb.mxu0 %v1453_v14 }
 0x5a9   :  { %982 = vmatpush.bf16.msrb.mxu0 %v1452_v15 }
 0x5b0   :  { %1158 = vrot.lane.b32.xlu0 %v2179_v49, %s1974_s2 }
 0x606   :  { %v728_v37 = vpop.permute.xlu1 %727 }
 0x607   :  { %v730_v38 = vadd.f32 %v728_v37, %v725_v35  ;;  %v1458_v35 = vld [vmem:[%s2264_s17] sm:$0xff]  ;;  %v1465_v37 = vld [vmem:[%s2266_s19 + $0x18] sm:$0xff] }
 0x608   :  { %1141 = vmatpush.bf16.msrb.mxu3 %v1465_v37 }
 0x609   :  { %v735_v40 = vpack.c.bf16 %v730_v38, %v730_v38 }
 0x60b   :  { %1310 = vmatmul.msk.bf16.vlgmr.msra.gmra.mxu0 %vm327_vm0, %v735_v40  ;;  %v1502_v40 = vld [vmem:[#allocation26] ss:$0 sm:$0xff] }
 0x688   :  { %v770_v43 = vpop.f32.mrf.mxu0 }
 0x689   :  { %v771_v44 = vadd.f32 %v1497_v42, %v770_v43 }
 0x68b   :  { %v774_v45 = vmax.f32 %v771_v44, 0.0 }
 0x68d   :  { %v775_v46 = vpack.c.bf16 %v774_v45, %v774_v45 }
 0x68f   :  { %1327 = vmatmul.msk.bf16.vlgmr.msra.gmra.mxu1 %vm382_vm1, %v775_v46  ;;  %v1462_v46 = vld [vmem:[%s2266_s19] sm:$0xff] }
 0x690   :  { %v772_v47 = vpop.f32.mrf.mxu0 }
 0x691   :  { %v1503_v47 = vld [vmem:[%s2265_s18] ss:$0 sm:$0xff]  ;;  %s1975_s18 = smov [#allocation28]  }
 0x70c   :  { %v826_v49 = vpop.f32.mrf.mxu1 }
 0x70d   :  { %v827_v50 = vadd.f32 %v1498_v48, %v826_v49 }
 0x70f   :  { %835 = vrot.lane.b32.xlu1 %v827_v50, %s1973_s9  ;;  %1517 = vtanh.f32 %v827_v50 }
 0x714   :  { %v828_v51 = vpop.f32.mrf.mxu1 }
 0x715   :  { %v1518_v54 = vpop.eup %1517 }
 0x716   :  { %v839_v55 = vsel %vm327_vm0, %v1518_v54, 0.0  ;;  %v831_v56 = vmul.f32 1.442695, %v1518_v54 }
 0x718   :  { %1519 = vpow2.f32 %v831_v56  ;;  %v1504_v56 = vld [vmem:[%s2267_s20] ss:$0 sm:$0xff] }
 0x71e   :  { %v1520_v57 = vpop.eup %1519 }
 0x71f   :  { %v833_v58 = vmul.f32 %v1520_v57, %v730_v38  ;;  %v1464_v38 = vld [vmem:[%s2266_s19 + $0x10] sm:$0xff]  ;;  %s1170_s19 = sshll.u32 %s1975_s18, 4  ;;  %s1171_s19 = int_to_ptr.vmem [resolvable:$true] %s1170_s19 }
 0x720   :  { %1142 = vmatpush.bf16.msrb.mxu3 %v1464_v38 }
 0x724   :  { %1143 = vmatpush.bf16.msrb.mxu3 %v1463_v39 }
 0x728   :  { %1144 = vmatpush.bf16.msrb.mxu3 %v1462_v46 }
 0x739   :  { %840 = vadd.xlane.f32.xlu1 %v839_v55  ;;  %v733_v55 = vpop.xlane.xlu0 %732 }
 0x741   :  { %v1159_v63 = vpop.permute.xlu0 %1158 }
 0x781   :  { %v836_v59 = vpop.permute.xlu1 %835 }
 0x782   :  { %v838_v60 = vadd.f32 %v836_v59, %v833_v58 }
 0x784   :  { %v843_v61 = vpack.c.bf16 %v838_v60, %v838_v60 }
 0x786   :  { %1336 = vmatmul.msk.bf16.vlgmr.msra.gmra.mxu2 %vm327_vm0, %v843_v61 }
 0x7ac   :  { %v841_v59 = vpop.xlane.xlu1 %840 }
 0x809   :  { %v878_v3 = vpop.f32.mrf.mxu2 }
 0x80a   :  { %v879_v4 = vadd.f32 %v1499_v2, %v878_v3 }
 0x80c   :  { %v882_v5 = vmax.f32 %v879_v4, 0.0 }
 0x80e   :  { %v883_v6 = vpack.c.bf16 %v882_v5, %v882_v5 }
 0x810   :  { %1353 = vmatmul.msk.bf16.vlgmr.msra.gmra.mxu3 %vm382_vm1, %v883_v6 }
 0x811   :  { %v880_v7 = vpop.f32.mrf.mxu2 }
 0x893   :  { %v934_v10 = vpop.f32.mrf.mxu3 }
 0x894   :  { %v935_v11 = vadd.f32 %v1500_v8, %v934_v10 }
 0x896   :  { %943 = vrot.lane.b32.xlu2 %v935_v11, %s1973_s9  ;;  %1521 = vtanh.f32 %v935_v11 }
 0x89b   :  { %v936_v12 = vpop.f32.mrf.mxu3 }
 0x89c   :  { %v1522_v16 = vpop.eup %1521 }
 0x89d   :  { %v947_v17 = vsel %vm327_vm0, %v1522_v16, 0.0  ;;  %v939_v18 = vmul.f32 1.442695, %v1522_v16 }
 0x89f   :  { %1523 = vpow2.f32 %v939_v18 }
 0x8a5   :  { %v1524_v19 = vpop.eup %1523 }
 0x8a6   :  { %v941_v20 = vmul.f32 %v1524_v19, %v838_v60 }
 0x8bf   :  { %624 = vadd.xlane.f32.xlu2 %v623_v13 }
 0x8c7   :  { %948 = vadd.xlane.f32.xlu2 %v947_v17 }
 0x8df   :  { %1152 = vrot.lane.b32.xlu2 %v2175_v36, %s1974_s2  ;;  %v1461_v36 = vld [vmem:[%s2264_s17 + $0x18] sm:$0xff] }
 0x8e0   :  { %1087 = vmatpush.bf16.msrb.mxu2 %v1461_v36 }
 0x8e4   :  { %1088 = vmatpush.bf16.msrb.mxu2 %v1460_v27 }
 0x8e8   :  { %1089 = vmatpush.bf16.msrb.mxu2 %v1459_v28 }
 0x8ec   :  { %1090 = vmatpush.bf16.msrb.mxu2 %v1458_v35 }
 0x8f0   :  { %v944_v21 = vpop.permute.xlu2 %943 }
 0x8f1   :  { %v946_v22 = vadd.f32 %v944_v21, %v941_v20 }
 0x8f3   :  { %v951_v23 = vpack.c.bf16 %v946_v22, %v946_v22 }
 0x8f5   :  { %1362 = vmatmul.msk.bf16.vlgmr.msrb.gmra.mxu0 %vm327_vm0, %v951_v23 }
 0x932   :  { %v625_v53 = vpop.xlane.xlu2 %624 }
 0x933   :  { %v734_v57 = vadd.f32 %v733_v55, %v625_v53 }
 0x935   :  { %v842_v61 = vadd.f32 %v841_v59, %v734_v57 }
 0x93a   :  { %v949_v54 = vpop.xlane.xlu2 %948 }
 0x93b   :  { %v950_v0 = vadd.f32 %v949_v54, %v842_v61 }
 0x942   :  { %v1153_v62 = vpop.permute.xlu2 %1152 }
 0x972   :  { %v984_v30 = vpop.f32.mrf.mxu0 }
 0x973   :  { %v985_v31 = vadd.f32 %v1501_v29, %v984_v30 }
 0x975   :  { %v988_v32 = vmax.f32 %v985_v31, 0.0 }
 0x977   :  { %v989_v33 = vpack.c.bf16 %v988_v32, %v988_v32 }
 0x979   :  { %1379 = vmatmul.msk.bf16.vlgmr.msrb.gmra.mxu1 %vm382_vm1, %v989_v33 }
 0x97a   :  { %v986_v34 = vpop.f32.mrf.mxu0 }
 0x9f6   :  { %v1038_v41 = vpop.f32.mrf.mxu1 }
 0x9f7   :  { %v1039_v42 = vadd.f32 %v1502_v40, %v1038_v41 }
 0x9f9   :  { %v1042_v43 = vmax.f32 %v1039_v42, 0.0 }
 0x9fb   :  { %v1043_v44 = vpack.c.bf16 %v1042_v43, %v1042_v43 }
 0x9fd   :  { %1396 = vmatmul.msk.bf16.vlgmr.msrb.gmra.mxu2 %vm382_vm1, %v1043_v44 }
 0x9fe   :  { %v1040_v45 = vpop.f32.mrf.mxu1 }
 0xa80   :  { %v1092_v48 = vpop.f32.mrf.mxu2 }
 0xa81   :  { %v1093_v49 = vadd.f32 %v1503_v47, %v1092_v48 }
 0xa83   :  { %v1096_v50 = vmax.f32 %v1093_v49, 0.0 }
 0xa85   :  { %v1097_v51 = vpack.c.bf16 %v1096_v50, %v1096_v50 }
 0xa87   :  { %1413 = vmatmul.msk.bf16.vlgmr.msrb.gmra.mxu3 %vm382_vm1, %v1097_v51 }
 0xa88   :  { %v1094_v52 = vpop.f32.mrf.mxu2 }
 0xb0a   :  { %v1146_v58 = vpop.f32.mrf.mxu3 }
 0xb0b   :  { %v1147_v60 = vadd.f32 %v1504_v56, %v1146_v58 }
 0xb0d   :  { %1150 = vst.msk [vmem:[#allocation28] sm:$0xff] %vm327_vm0, %v1147_v60 }
 0xb0e   :  { %1156 = vst.msk [vmem:[#allocation28] sm:$0xff] %vm1155_vm2, %v1153_v62 }
 0xb0f   :  { %1162 = vst.msk [vmem:[#allocation28] sm:$0xff] %vm1161_vm3, %v1159_v63 }
 0xb10   :  { %1164 = vst.msk [vmem:[#allocation28] sm:$0xff] %vm1163_vm4, %v950_v0 }
 0xb11   :  { %1175 = dma.vmem_to_hbm [thread:$0]  %s1171_s19, 128, %s1173_s25, [#allocation4]  }
 0xb12   :  { %v1148_v1 = vpop.f32.mrf.mxu3 }
 0xb13   :  { %1951 = dma.done.wait [#allocation4], 128  }
 0xb14   :  { %1952 = vsyncadd [#allocation4], 4294967168 }
 0xb15   :  { %1180 = vsyncpa [#allocation3], 1 }
 0xb16   :  { %1181 = vsyncpa [#allocation6], 1 }
 0xb17   :  { %1182 = vsyncpa [#allocation9], 1 }
 0xb18   :  { %1183 = vsyncpa [#allocation12], 1 }
 0xb19   :  { %1184 = vsyncpa [#allocation15], 1 }
 0xb1a   :  { %1185 = vsyncpa [#allocation18], 1 }
 0xb1b   :  { %1186 = vsyncpa [#allocation21], 1 }
 0xb1c   :  { %1187 = vsyncpa [#allocation24], 1 }
 0xb1d   :  { %1188 = vsyncpa [#allocation27], 1 }
 0xb1e   :  { %1189 = vsyncpa [#allocation4], 1 }

</bundles_post_ra>
